<compile_context>
chip_gen: v7x
topology: tpu7x:2x2x1
jax: 0.10.0
libtpu: 0.0.40
codegen_flags: <defaults>
</compile_context>

<pallas_src>
import jax
import jax.numpy as jnp
from jax.experimental import pallas as pl
from jax.experimental.pallas import tpu as pltpu  # noqa: F401  (TPU backend)


def _head_kernel(f_ref, w_ref, b_ref, o_ref):
    """Fused AdaptiveAvgPool2d((1,1)) -> flatten -> Linear, single shot.

    f_ref : (B, HW, C) bf16 feature map, channels-last (C on lanes)
    w_ref : (C, E)     f32 transposed nn.Linear weight
    b_ref : (1, E)     f32 bias
    o_ref : (B, E)     f32 output embeddings
    """
    hw = f_ref.shape[1]
    # Upcast once after load (free on v6e/v7x, required on v5e), then reduce
    # over the spatial/sublane axis in f32.
    feats = f_ref[...].astype(jnp.float32)            # (B, HW, C)
    pooled = jnp.sum(feats, axis=1)                   # (B, C)  — XLU sublane reduce
    acc = jnp.dot(pooled, w_ref[...],
                  preferred_element_type=jnp.float32)  # (B, E)  — MXU
    o_ref[...] = (acc * (1.0 / hw) + b_ref[...]).astype(o_ref.dtype)


def cnn_model_head(features_nhwc, weight_t, bias):
    """CNNModel tail: avgpool -> flatten -> linear as one Pallas call.

    features_nhwc : (B, H, W, C) bf16/f32 -- frozen resnet trunk output,
                    channels-last (the layout XLA TPU convs natively emit)
    weight_t      : (C, E) float32        -- transposed nn.Linear weight
    bias          : (E,)  float32
    returns       : (B, E) float32        -- `linear_features`
    """
    B, H, W, C = features_nhwc.shape
    E = weight_t.shape[1]

    # Free, contiguous reshape; C stays on the lane axis.
    f = features_nhwc.reshape(B, H * W, C)
    b2 = bias.reshape(1, E)

    feat_bytes = f.size * f.dtype.itemsize
    w_bytes = weight_t.size * weight_t.dtype.itemsize
    out_bytes = B * E * 4
    cost = pl.CostEstimate(
        flops=2 * B * C * E + B * H * W * C,
        transcendentals=0,
        bytes_accessed=feat_bytes + w_bytes + E * 4 + out_bytes,
    )

    return pl.pallas_call(
        _head_kernel,
        out_shape=jax.ShapeDtypeStruct((B, E), jnp.float32),
        # Single block == full arrays; everything lands in VMEM once.
        in_specs=[
            pl.BlockSpec((B, H * W, C), lambda: (0, 0, 0)),
            pl.BlockSpec((C, E), lambda: (0, 0)),
            pl.BlockSpec((1, E), lambda: (0, 0)),
        ],
        out_specs=pl.BlockSpec((B, E), lambda: (0, 0)),
        cost_estimate=cost,
    )(f, weight_t, b2)


if __name__ == "__main__":
    key = jax.random.PRNGKey(0)
    k_img, k_feat, k_w, k_b = jax.random.split(key, 4)

    B = 2                     # batch
    C = 2048                  # resnet.fc.in_features (ResNet-152)
    H = W = 7                 # spatial extent of layer4 output
    E = 32                    # embedding_size (small)

    # Nominal module input (NCHW images) — kept for interface fidelity only.
    input_images = jax.random.normal(k_img, (B, 3, 16, 16), jnp.float32)

    # TODO(synk): the pretrained, frozen ResNet-152 conv trunk (conv1..layer4,
    # run under torch.no_grad) has no clean in-script Pallas equivalent without
    # its IMAGENET1K_V1 checkpoint; its (B, 7, 7, 2048) channels-last bf16
    # feature map is synthesized deterministically here and fed to the fused
    # pool+linear kernel.
    features_nhwc = jax.random.normal(
        k_feat, (B, H, W, C), jnp.float32).astype(jnp.bfloat16)

    # Deterministic nn.Linear(2048, E) parameters (torch default-style uniform).
    bound = 1.0 / jnp.sqrt(jnp.float32(C))
    weight_t = jax.random.uniform(k_w, (C, E), jnp.float32, -bound, bound)
    bias = jax.random.uniform(k_b, (E,), jnp.float32, -bound, bound)

    out = cnn_model_head(features_nhwc, weight_t, bias)
    out = jax.block_until_ready(out)

    # Pure-JAX reference on the same bf16 features: avgpool -> flatten -> linear.
    feats_f32 = features_nhwc.astype(jnp.float32).reshape(B, H * W, C)
    ref = feats_f32.mean(axis=1) @ weight_t + bias
    assert out.shape == (B, E)
    assert jnp.allclose(out, ref, rtol=1e-4, atol=1e-4), "mismatch vs reference"

    print("KERNEL_OK")
</pallas_src>

<mosaic_0001>
module attributes {stable_mosaic.version = 11 : i64} {
  func.func @_head_kernel(%arg0: memref<2x49x2048xbf16, #tpu.memory_space<vmem>>, %arg1: memref<2048x32xf32, #tpu.memory_space<vmem>>, %arg2: memref<1x32xf32, #tpu.memory_space<vmem>>, %arg3: memref<2x32xf32, #tpu.memory_space<vmem>>) attributes {dimension_semantics = [], scalar_prefetch = 0 : i64, scratch_operands = 0 : i64, tpu.core_type = #tpu.core_type<tc>} {
    %c0 = arith.constant 0 : index
    %c0_0 = arith.constant 0 : index
    %c0_1 = arith.constant 0 : index
    %0 = vector.load %arg0[%c0, %c0_0, %c0_1] : memref<2x49x2048xbf16, #tpu.memory_space<vmem>>, vector<2x49x2048xbf16>
    %1 = arith.extf %0 : vector<2x49x2048xbf16> to vector<2x49x2048xf32>
    %cst = arith.constant dense<0.000000e+00> : vector<2x2048xf32>
    %2 = vector.multi_reduction <add>, %1, %cst [1] : vector<2x49x2048xf32> to vector<2x2048xf32>
    %c0_2 = arith.constant 0 : index
    %c0_3 = arith.constant 0 : index
    %3 = vector.load %arg1[%c0_2, %c0_3] : memref<2048x32xf32, #tpu.memory_space<vmem>>, vector<2048x32xf32>
    %cst_4 = arith.constant dense<0.000000e+00> : vector<2x32xf32>
    %4 = tpu.matmul %2, %3, %cst_4 {dimension_numbers = #tpu.dot_dimension_numbers<[1], [0], [0], [1], [0, 0, 1, 1], [], []>} : vector<2x2048xf32>, vector<2048x32xf32>, vector<2x32xf32> -> vector<2x32xf32>
    %cst_5 = arith.constant 0.0204081628 : f32
    %5 = vector.broadcast %cst_5 : f32 to vector<2x32xf32>
    %6 = arith.mulf %4, %5 : vector<2x32xf32>
    %c0_6 = arith.constant 0 : index
    %c0_7 = arith.constant 0 : index
    %7 = vector.load %arg2[%c0_6, %c0_7] : memref<1x32xf32, #tpu.memory_space<vmem>>, vector<1x32xf32>
    %8 = vector.broadcast %7 : vector<1x32xf32> to vector<2x32xf32>
    %9 = arith.addf %6, %8 : vector<2x32xf32>
    %c0_8 = arith.constant 0 : index
    %c0_9 = arith.constant 0 : index
    %10 = vector.load %arg3[%c0_8, %c0_9] : memref<2x32xf32, #tpu.memory_space<vmem>>, vector<2x32xf32>
    tpu.vector_store %arg3[%c0_8, %c0_9], %9 {strides = array<i32>} : memref<2x32xf32, #tpu.memory_space<vmem>>, vector<2x32xf32>,
    return
  }
}

</mosaic_0001>

<bundles_post_ra>
// kernel: tpu_custom_call.1
= control target key start
LH: loop header
LB: loop body
LE: loop exit
PB: predicated region body
PF: predicated region fallthrough
CT: control target
= control target key end

     0   :  { %vm356_vm0 = vcmask 1040384   ;;  %vm1056_vm1 = vcmask 1041409   ;;  %s4658_s0 = inlined_call_operand.vmem [shape: bf16[2,49,2048], index: 0, kind: input, shape index: {}]   ;;  %s4659_s1 = inlined_call_operand.vmem [shape: f32[2048,32], index: 1, kind: input, shape index: {}]   ;;  %s4660_s2 = inlined_call_operand.vmem [shape: f32[1,32], index: 2, kind: input, shape index: {}]   ;;  %s4661_s3 = inlined_call_operand.hbm [shape: f32[2,32], index: 3, kind: output, shape index: {}]  }
   0x1   :  { %v784_v0 = vld [vmem:[%s4659_s1 + $0x80] sm:$0xff]  ;;  %v785_v1 = vld [vmem:[%s4659_s1 + $0x88] sm:$0xff]  ;;  %v786_v11 = vld [vmem:[%s4659_s1 + $0x90] sm:$0xff] }
   0x2   :  { %v816_v2 = vld [vmem:[%s4659_s1 + $0x180] sm:$0xff]  ;;  %v1955_v3 = vpack.c.bf16 %v785_v1, %v784_v0  ;;  %v817_v4 = vld [vmem:[%s4659_s1 + $0x188] sm:$0xff]  ;;  %v787_v13 = vld [vmem:[%s4659_s1 + $0x98] sm:$0xff] }
   0x3   :  { %v768_v5 = vld [vmem:[%s4659_s1] sm:$0xff]  ;;  %v769_v6 = vld [vmem:[%s4659_s1 + $0x8] sm:$0xff]  ;;  %v1987_v7 = vpack.c.bf16 %v817_v4, %v816_v2  ;;  %v818_v14 = vld [vmem:[%s4659_s1 + $0x190] sm:$0xff]  ;;  %v1959_v16 = vpack.c.bf16 %v787_v13, %v786_v11 }
   0x4   :  { %v1957_v8 = vpack.c.bf16 %v769_v6, %v768_v5  ;;  %v800_v9 = vld [vmem:[%s4659_s1 + $0x100] sm:$0xff]  ;;  %v801_v10 = vld [vmem:[%s4659_s1 + $0x108] sm:$0xff]  ;;  %1956 = vmatprep.subr.bf16.mxu0 %v1955_v3  ;;  %v819_v15 = vld [vmem:[%s4659_s1 + $0x198] sm:$0xff] }
   0x5   :  { %v1989_v12 = vpack.c.bf16 %v801_v10, %v800_v9  ;;  %1988 = vmatprep.subr.bf16.mxu1 %v1987_v7  ;;  %v1991_v17 = vpack.c.bf16 %v819_v15, %v818_v14  ;;  %v770_v18 = vld [vmem:[%s4659_s1 + $0x10] sm:$0xff]  ;;  %v771_v19 = vld [vmem:[%s4659_s1 + $0x18] sm:$0xff]  ;;  %v788_v23 = vld [vmem:[%s4659_s1 + $0xa0] sm:$0xff] }
   0x6   :  { %1958 = vmatpush3.bf16.msra.mxu0 %v1957_v8  ;;  %v802_v20 = vld [vmem:[%s4659_s1 + $0x110] sm:$0xff]  ;;  %v1961_v21 = vpack.c.bf16 %v771_v19, %v770_v18  ;;  %v803_v22 = vld [vmem:[%s4659_s1 + $0x118] sm:$0xff]  ;;  %v789_v24 = vld [vmem:[%s4659_s1 + $0xa8] sm:$0xff] }
   0x7   :  { %1990 = vmatpush3.bf16.msra.mxu1 %v1989_v12  ;;  %1960 = vmatprep.subr.bf16.mxu0 %v1959_v16  ;;  %v1993_v25 = vpack.c.bf16 %v803_v22, %v802_v20  ;;  %v1963_v26 = vpack.c.bf16 %v789_v24, %v788_v23  ;;  %v820_v27 = vld [vmem:[%s4659_s1 + $0x1a0] sm:$0xff]  ;;  %v821_v28 = vld [vmem:[%s4659_s1 + $0x1a8] sm:$0xff]  ;;  %v790_v35 = vld [vmem:[%s4659_s1 + $0xb0] sm:$0xff] }
   0x8   :  { %1992 = vmatprep.subr.bf16.mxu1 %v1991_v17  ;;  %v772_v29 = vld [vmem:[%s4659_s1 + $0x20] sm:$0xff]  ;;  %v1995_v30 = vpack.c.bf16 %v821_v28, %v820_v27  ;;  %v773_v31 = vld [vmem:[%s4659_s1 + $0x28] sm:$0xff]  ;;  %v791_v36 = vld [vmem:[%s4659_s1 + $0xb8] sm:$0xff] }
   0x9   :  { %v804_v32 = vld [vmem:[%s4659_s1 + $0x120] sm:$0xff]  ;;  %v805_v33 = vld [vmem:[%s4659_s1 + $0x128] sm:$0xff]  ;;  %v1965_v34 = vpack.c.bf16 %v773_v31, %v772_v29  ;;  %v822_v37 = vld [vmem:[%s4659_s1 + $0x1b0] sm:$0xff]  ;;  %v1967_v39 = vpack.c.bf16 %v791_v36, %v790_v35 }
   0xa   :  { %1962 = vmatpush3.bf16.msra.mxu0 %v1961_v21  ;;  %v1997_v38 = vpack.c.bf16 %v805_v33, %v804_v32  ;;  %v823_v40 = vld [vmem:[%s4659_s1 + $0x1b8] sm:$0xff]  ;;  %v774_v41 = vld [vmem:[%s4659_s1 + $0x30] sm:$0xff]  ;;  %v792_v46 = vld [vmem:[%s4659_s1 + $0xc0] sm:$0xff] }
   0xb   :  { %1994 = vmatpush3.bf16.msra.mxu1 %v1993_v25  ;;  %1964 = vmatprep.subr.bf16.mxu0 %v1963_v26  ;;  %v775_v42 = vld [vmem:[%s4659_s1 + $0x38] sm:$0xff]  ;;  %v1999_v43 = vpack.c.bf16 %v823_v40, %v822_v37  ;;  %v806_v44 = vld [vmem:[%s4659_s1 + $0x130] sm:$0xff]  ;;  %v793_v47 = vld [vmem:[%s4659_s1 + $0xc8] sm:$0xff] }
   0xc   :  { %1996 = vmatprep.subr.bf16.mxu1 %v1995_v30  ;;  %v807_v45 = vld [vmem:[%s4659_s1 + $0x138] sm:$0xff]  ;;  %v824_v48 = vld [vmem:[%s4659_s1 + $0x1c0] sm:$0xff]  ;;  %v825_v49 = vld [vmem:[%s4659_s1 + $0x1c8] sm:$0xff]  ;;  %v1969_v50 = vpack.c.bf16 %v775_v42, %v774_v41  ;;  %v1971_v54 = vpack.c.bf16 %v793_v47, %v792_v46 }
   0xd   :  { %v776_v51 = vld [vmem:[%s4659_s1 + $0x40] sm:$0xff]  ;;  %v777_v52 = vld [vmem:[%s4659_s1 + $0x48] sm:$0xff]  ;;  %v2001_v53 = vpack.c.bf16 %v807_v45, %v806_v44  ;;  %v794_v57 = vld [vmem:[%s4659_s1 + $0xd0] sm:$0xff]  ;;  %v2003_v58 = vpack.c.bf16 %v825_v49, %v824_v48 }
   0xe   :  { %1966 = vmatpush3.bf16.msra.mxu0 %v1965_v34  ;;  %v808_v55 = vld [vmem:[%s4659_s1 + $0x140] sm:$0xff]  ;;  %v809_v56 = vld [vmem:[%s4659_s1 + $0x148] sm:$0xff]  ;;  %v795_v59 = vld [vmem:[%s4659_s1 + $0xd8] sm:$0xff]  ;;  %v1973_v2 = vpack.c.bf16 %v777_v52, %v776_v51 }
   0xf   :  { %1998 = vmatpush3.bf16.msra.mxu1 %v1997_v38  ;;  %1968 = vmatprep.subr.bf16.mxu0 %v1967_v39  ;;  %v826_v60 = vld [vmem:[%s4659_s1 + $0x1d0] sm:$0xff]  ;;  %v827_v61 = vld [vmem:[%s4659_s1 + $0x1d8] sm:$0xff]  ;;  %v796_v3 = vld [vmem:[%s4659_s1 + $0xe0] sm:$0xff]  ;;  %v2005_v6 = vpack.c.bf16 %v809_v56, %v808_v55  ;;  %v1975_v7 = vpack.c.bf16 %v795_v59, %v794_v57 }
  0x10   :  { %2000 = vmatprep.subr.bf16.mxu1 %v1999_v43  ;;  %v778_v62 = vld [vmem:[%s4659_s1 + $0x50] sm:$0xff]  ;;  %v779_v63 = vld [vmem:[%s4659_s1 + $0x58] sm:$0xff]  ;;  %v797_v4 = vld [vmem:[%s4659_s1 + $0xe8] sm:$0xff]  ;;  %v2007_v11 = vpack.c.bf16 %v827_v61, %v826_v60 }
  0x11   :  { %v810_v0 = vld [vmem:[%s4659_s1 + $0x150] sm:$0xff]  ;;  %v811_v1 = vld [vmem:[%s4659_s1 + $0x158] sm:$0xff]  ;;  %v2410_v5 = vld [vmem:[%s4659_s1 + $0x1e0] sm:$0xff]  ;;  %v1977_v18 = vpack.c.bf16 %v779_v63, %v778_v62  ;;  %v1979_v23 = vpack.c.bf16 %v797_v4, %v796_v3 }
  0x12   :  { %1970 = vmatpush3.bf16.msra.mxu0 %v1969_v50  ;;  %v829_v8 = vld [vmem:[%s4659_s1 + $0x1e8] sm:$0xff]  ;;  %v2418_v9 = vld [vmem:[%s4659_s1 + $0x60] sm:$0xff]  ;;  %v2438_v14 = vld [vmem:[%s4659_s1 + $0xf0] sm:$0xff]  ;;  %v2009_v19 = vpack.c.bf16 %v811_v1, %v810_v0 }
  0x13   :  { %2002 = vmatpush3.bf16.msra.mxu1 %v2001_v53  ;;  %1972 = vmatprep.subr.bf16.mxu0 %v1971_v54  ;;  %v2423_v10 = vld [vmem:[%s4659_s1 + $0x68] sm:$0xff]  ;;  %v2428_v12 = vld [vmem:[%s4659_s1 + $0x160] sm:$0xff]  ;;  %v2443_v15 = vld [vmem:[%s4659_s1 + $0xf8] sm:$0xff]  ;;  %v2011_v24 = vpack.c.bf16 %v829_v8, %v2410_v5 }
  0x14   :  { %2004 = vmatprep.subr.bf16.mxu1 %v2003_v58  ;;  %v2433_v13 = vld [vmem:[%s4659_s1 + $0x168] sm:$0xff]  ;;  %v2448_v16 = vld [vmem:[%s4659_s1 + $0x1f0] sm:$0xff]  ;;  %v2453_v17 = vld [vmem:[%s4659_s1 + $0x1f8] sm:$0xff]  ;;  %v1981_v25 = vpack.c.bf16 %v2423_v10, %v2418_v9  ;;  %v1983_v30 = vpack.c.bf16 %v2443_v15, %v2438_v14 }
  0x15   :  { %v2458_v20 = vld [vmem:[%s4659_s1 + $0x70] sm:$0xff]  ;;  %v2463_v21 = vld [vmem:[%s4659_s1 + $0x78] sm:$0xff]  ;;  %v2481_v27 = vld [vmem:[%s4658_s0] sm:$0xff]  ;;  %v2013_v29 = vpack.c.bf16 %v2433_v13, %v2428_v12  ;;  %v2015_v36 = vpack.c.bf16 %v2453_v17, %v2448_v16 }
  0x16   :  { %1974 = vmatpush3.bf16.msra.mxu0 %v1973_v2  ;;  %v2468_v22 = vld [vmem:[%s4659_s1 + $0x170] sm:$0xff]  ;;  %v2476_v26 = vld [vmem:[%s4659_s1 + $0x178] sm:$0xff]  ;;  %v2486_v28 = vld [vmem:[%s4658_s0 + $0x40] sm:$0xff]  ;;  %v128_v34 = vunpack.c.h.bf16 %v2481_v27  ;;  %v1985_v37 = vpack.c.bf16 %v2463_v21, %v2458_v20  ;;  %v127_v49 = vunpack.c.l.bf16 %v2481_v27 }
  0x17   :  { %2006 = vmatpush3.bf16.msra.mxu1 %v2005_v6  ;;  %1976 = vmatprep.subr.bf16.mxu0 %v1975_v7  ;;  %v2495_v31 = vld [vmem:[%s4658_s0 + $0x80] sm:$0xff]  ;;  %v144_v35 = vunpack.c.h.bf16 %v2486_v28  ;;  %v2017_v38 = vpack.c.bf16 %v2476_v26, %v2468_v22  ;;  %v2573_v60 = vld [vmem:[%s4658_s0 + $0x8] sm:$0xff]  ;;  %v143_v63 = vunpack.c.l.bf16 %v2486_v28 }
  0x18   :  { %2008 = vmatprep.subr.bf16.mxu1 %v2007_v11  ;;  %v2500_v32 = vld [vmem:[%s4658_s0 + $0xc0] sm:$0xff]  ;;  %v160_v42 = vunpack.c.h.bf16 %v2495_v31  ;;  %v2578_v61 = vld [vmem:[%s4658_s0 + $0x48] sm:$0xff]  ;;  %v159_v5 = vunpack.c.l.bf16 %v2495_v31  ;;  %v130_v11 = vunpack.c.h.bf16 %v2573_v60  ;;  %v129_v31 = vunpack.c.l.bf16 %v2573_v60 }
  0x19   :  { %v2505_v33 = vld [vmem:[%s4658_s0 + $0x100] sm:$0xff]  ;;  %v176_v46 = vunpack.c.h.bf16 %v2500_v32  ;;  %v365_v48 = vadd.f32 %v144_v35, %v128_v34  ;;  %v2583_v62 = vld [vmem:[%s4658_s0 + $0x88] sm:$0xff]  ;;  %v146_v12 = vunpack.c.h.bf16 %v2578_v61 }
  0x1a   :  { %v2518_v39 = vld [vmem:[%s4658_s0 + $0x140] sm:$0xff]  ;;  %1978 = vmatpush3.bf16.msra.mxu0 %v1977_v18  ;;  %v192_v53 = vunpack.c.h.bf16 %v2505_v33  ;;  %v2591_v3 = vld [vmem:[%s4658_s0 + $0xc8] sm:$0xff] }
  0x1b   :  { %v2523_v40 = vld [vmem:[%s4658_s0 + $0x180] sm:$0x11]  ;;  %2010 = vmatpush3.bf16.msra.mxu1 %v2009_v19  ;;  %1980 = vmatprep.subr.bf16.mxu0 %v1979_v23  ;;  %v208_v57 = vunpack.c.h.bf16 %v2518_v39  ;;  %v366_v59 = vadd.f32 %v365_v48, %v160_v42  ;;  %v2596_v4 = vld [vmem:[%s4658_s0 + $0x108] sm:$0xff]  ;;  %v162_v19 = vunpack.c.h.bf16 %v2583_v62  ;;  %v178_v42 = vunpack.c.h.bf16 %v2591_v3 }
  0x1c   :  { %v2528_v41 = vld [vmem:[%s4658_s0 + $0x1c0] sm:$0xff]  ;;  %v224_v54 = vunpack.c.h.bf16 %v2523_v40  ;;  %2012 = vmatprep.subr.bf16.mxu1 %v2011_v24  ;;  %v2603_v8 = vld [vmem:[%s4658_s0 + $0x188] sm:$0x11] }
  0x1d   :  { %v2534_v43 = vld [vmem:[%s4658_s0 + $0x200] sm:$0xff]  ;;  %v240_v47 = vunpack.c.h.bf16 %v2528_v41  ;;  %v367_v7 = vadd.f32 %v366_v59, %v176_v46  ;;  %v2608_v9 = vld [vmem:[%s4658_s0 + $0x1c8] sm:$0xff]  ;;  %v194_v46 = vunpack.c.h.bf16 %v2596_v4 }
  0x1e   :  { %v2539_v44 = vld [vmem:[%s4658_s0 + $0x240] sm:$0xff]  ;;  %v256_v55 = vunpack.c.h.bf16 %v2534_v43  ;;  %1982 = vmatpush3.bf16.msra.mxu0 %v1981_v25  ;;  %v2613_v10 = vld [vmem:[%s4658_s0 + $0x208] sm:$0xff]  ;;  %v370_v13 = vsel %vm356_vm0, %v224_v54, 0.0 }
  0x1f   :  { %v2544_v45 = vld [vmem:[%s4658_s0 + $0x280] sm:$0xff]  ;;  %v272_v56 = vunpack.c.h.bf16 %v2539_v44  ;;  %2014 = vmatpush3.bf16.msra.mxu1 %v2013_v29  ;;  %1984 = vmatprep.subr.bf16.mxu0 %v1983_v30  ;;  %v2622_v16 = vld [vmem:[%s4658_s0 + $0x148] sm:$0xff]  ;;  %v368_v23 = vadd.f32 %v367_v7, %v192_v53  ;;  %v226_v29 = vunpack.c.h.bf16 %v2603_v8  ;;  %v242_v30 = vunpack.c.h.bf16 %v2608_v9 }
  0x20   :  { %v2552_v50 = vld [vmem:[%s4658_s0 + $0x2c0] sm:$0xff]  ;;  %v288_v0 = vunpack.c.h.bf16 %v2544_v45  ;;  %v573_v2 = vadd.f32 %v256_v55, %v240_v47  ;;  %v2627_v17 = vld [vmem:[%s4658_s0 + $0x248] sm:$0xff]  ;;  %2016 = vmatprep.subr.bf16.mxu1 %v2015_v36  ;;  %v258_v34 = vunpack.c.h.bf16 %v2613_v10  ;;  %v210_v53 = vunpack.c.h.bf16 %v2622_v16 }
  0x21   :  { %v2557_v51 = vld [vmem:[%s4658_s0 + $0x300] sm:$0xff]  ;;  %v304_v1 = vunpack.c.h.bf16 %v2552_v50  ;;  %v2632_v18 = vld [vmem:[%s4658_s0 + $0x288] sm:$0xff]  ;;  %v274_v47 = vunpack.c.h.bf16 %v2627_v17  ;;  %v369_v48 = vadd.f32 %v368_v23, %v208_v57  ;;  %v391_v55 = vadd.f32 %v146_v12, %v130_v11 }
  0x22   :  { %v2562_v52 = vld [vmem:[%s4658_s0 + $0x340] sm:$0x11]  ;;  %v320_v6 = vunpack.c.h.bf16 %v2557_v51  ;;  %v574_v14 = vadd.f32 %v573_v2, %v272_v56  ;;  %v2638_v24 = vld [vmem:[%s4658_s0 + $0x2c8] sm:$0xff]  ;;  %1986 = vmatpush3.bf16.msra.mxu0 %v1985_v37  ;;  %v290_v54 = vunpack.c.h.bf16 %v2632_v18  ;;  %v396_v37 = vsel %vm356_vm0, %v226_v29, 0.0 }
  0x23   :  { %v336_v58 = vunpack.c.h.bf16 %v2562_v52  ;;  %v2643_v25 = vld [vmem:[%s4658_s0 + $0x348] sm:$0x11]  ;;  %2018 = vmatpush3.bf16.msra.mxu1 %v2017_v38  ;;  %v371_v2 = vadd.f32 %v370_v13, %v369_v48  ;;  %v392_v21 = vadd.f32 %v391_v55, %v162_v19  ;;  %v175_v11 = vunpack.c.l.bf16 %v2500_v32 }
  0x24   :  { %v575_v35 = vadd.f32 %v574_v14, %v288_v0  ;;  %v2651_v36 = vld [vmem:[%s4658_s0 + $0x308] sm:$0xff]  ;;  %v338_v59 = vunpack.c.h.bf16 %v2643_v25  ;;  %v599_v0 = vadd.f32 %v258_v34, %v242_v30  ;;  %v191_v12 = vunpack.c.l.bf16 %v2505_v33 }
  0x25   :  { %v578_v15 = vsel %vm356_vm0, %v336_v58, 0.0  ;;  %v306_v58 = vunpack.c.h.bf16 %v2638_v24  ;;  %v322_v20 = vunpack.c.h.bf16 %v2651_v36  ;;  %v372_v22 = vrot.slane %v371_v2, 4 }
  0x26   :  { %v576_v56 = vadd.f32 %v575_v35, %v304_v1  ;;  %v600_v7 = vadd.f32 %v599_v0, %v274_v47  ;;  %v393_v26 = vadd.f32 %v392_v21, %v178_v42  ;;  %v239_v38 = vunpack.c.l.bf16 %v2528_v41 }
  0x27   :  { %v255_v1 = vunpack.c.l.bf16 %v2534_v43  ;;  %v604_v13 = vsel %vm356_vm0, %v338_v59, 0.0  ;;  %v207_v19 = vunpack.c.l.bf16 %v2518_v39  ;;  %v373_v30 = vadd.f32 %v372_v22, %v371_v2 }
  0x28   :  { %v577_v57 = vadd.f32 %v576_v56, %v320_v6  ;;  %v601_v23 = vadd.f32 %v600_v7, %v290_v54  ;;  %v394_v29 = vadd.f32 %v393_v26, %v194_v46  ;;  %v223_v6 = vunpack.c.l.bf16 %v2523_v40 }
  0x29   :  { %v271_v32 = vunpack.c.l.bf16 %v2539_v44  ;;  %v287_v35 = vunpack.c.l.bf16 %v2544_v45  ;;  %v351_v41 = vadd.f32 %v143_v63, %v127_v49  ;;  %v374_v43 = vrot.slane %v373_v30, 2 }
  0x2a   :  { %v579_v14 = vadd.f32 %v578_v15, %v577_v57  ;;  %v602_v33 = vadd.f32 %v601_v23, %v306_v58  ;;  %v395_v15 = vadd.f32 %v394_v29, %v210_v53  ;;  %v335_v39 = vunpack.c.l.bf16 %v2562_v52 }
  0x2b   :  { %v560_v42 = vadd.f32 %v255_v1, %v239_v38  ;;  %v303_v40 = vunpack.c.l.bf16 %v2552_v50  ;;  %v352_v44 = vadd.f32 %v351_v41, %v159_v5  ;;  %v375_v48 = vadd.f32 %v374_v43, %v373_v30 }
  0x2c   :  { %v580_v34 = vrot.slane %v579_v14, 4  ;;  %v603_v47 = vadd.f32 %v602_v33, %v322_v20  ;;  %v397_v45 = vadd.f32 %v396_v37, %v395_v15  ;;  %v319_v27 = vunpack.c.l.bf16 %v2557_v51 }
  0x2d   :  { %v561_v54 = vadd.f32 %v560_v42, %v271_v32  ;;  %v353_v63 = vadd.f32 %v352_v44, %v175_v11  ;;  %v357_v53 = vsel %vm356_vm0, %v223_v6, 0.0  ;;  %v376_v55 = vrot.slane %v375_v48, 1 }
  0x2e   :  { %v581_v46 = vadd.f32 %v580_v34, %v579_v14  ;;  %v605_v49 = vadd.f32 %v604_v13, %v603_v47  ;;  %v398_v52 = vrot.slane %v397_v45, 4  ;;  %v565_v58 = vsel %vm356_vm0, %v335_v39, 0.0 }
  0x2f   :  { %v562_v56 = vadd.f32 %v561_v54, %v287_v35  ;;  %v354_v0 = vadd.f32 %v353_v63, %v191_v12  ;;  %v145_v51 = vunpack.c.l.bf16 %v2578_v61  ;;  %v161_v20 = vunpack.c.l.bf16 %v2583_v62  ;;  %v2737_v63 = vld [vmem:[%s4659_s1 + $0x290] sm:$0xff] }
  0x30   :  { %v582_v28 = vrot.slane %v581_v46, 2  ;;  %v606_v50 = vrot.slane %v605_v49, 4  ;;  %v399_v5 = vadd.f32 %v398_v52, %v397_v45  ;;  %v377_v21 = vadd.f32 %v376_v55, %v375_v48  ;;  %v2721_v48 = vld [vmem:[%s4659_s1 + $0x208] sm:$0xff]  ;;  %v2726_v45 = vld [vmem:[%s4659_s1 + $0x300] sm:$0xff] }
  0x31   :  { %v563_v2 = vadd.f32 %v562_v56, %v303_v40  ;;  %v355_v7 = vadd.f32 %v354_v0, %v207_v19  ;;  %v177_v26 = vunpack.c.l.bf16 %v2591_v3  ;;  %v241_v38 = vunpack.c.l.bf16 %v2608_v9 }
  0x32   :  { %v583_v59 = vadd.f32 %v582_v28, %v581_v46  ;;  %v607_v57 = vadd.f32 %v606_v50, %v605_v49  ;;  %v400_v11 = vrot.slane %v399_v5, 2  ;;  %v257_v60 = vunpack.c.l.bf16 %v2613_v10  ;;  %v848_v10 = vld [vmem:[%s4659_s1 + $0x280] sm:$0xff]  ;;  %v2732_v49 = vld [vmem:[%s4659_s1 + $0x308] sm:$0xff]  ;;  %v2759_v50 = vld [vmem:[%s4659_s1 + $0x390] sm:$0xff] }
  0x33   :  { %v564_v22 = vadd.f32 %v563_v2, %v319_v27  ;;  %v358_v14 = vadd.f32 %v357_v53, %v355_v7  ;;  %v193_v61 = vunpack.c.l.bf16 %v2596_v4  ;;  %v225_v62 = vunpack.c.l.bf16 %v2603_v8  ;;  %v849_v4 = vld [vmem:[%s4659_s1 + $0x288] sm:$0xff]  ;;  %v2742_v53 = vld [vmem:[%s4659_s1 + $0x298] sm:$0xff] }
  0x34   :  { %v584_v37 = vrot.slane %v583_v59, 1  ;;  %v608_v12 = vrot.slane %v607_v57, 2  ;;  %v401_v23 = vadd.f32 %v400_v11, %v399_v5  ;;  %v273_v6 = vunpack.c.l.bf16 %v2627_v17  ;;  %v880_v17 = vld [vmem:[%s4659_s1 + $0x380] sm:$0xff]  ;;  %v2769_v5 = vld [vmem:[%s4659_s1 + $0x310] sm:$0xff]  ;;  %v2774_v2 = vld [vmem:[%s4659_s1 + $0x318] sm:$0xff] }
  0x35   :  { %v566_v13 = vadd.f32 %v565_v58, %v564_v22  ;;  %v359_v29 = vrot.slane %v358_v14, 4  ;;  %v289_v32 = vunpack.c.l.bf16 %v2632_v18  ;;  %v378_v34 = vadd.f32 %v145_v51, %v129_v31  ;;  %v881_v18 = vld [vmem:[%s4659_s1 + $0x388] sm:$0xff]  ;;  %v2749_v58 = vld [vmem:[%s4659_s1 + $0x210] sm:$0xff]  ;;  %v2779_v51 = vld [vmem:[%s4659_s1 + $0x2a0] sm:$0xff] }
  0x36   :  { %v585_v1 = vadd.f32 %v584_v37, %v583_v59  ;;  %v609_v19 = vadd.f32 %v608_v12, %v607_v57  ;;  %v402_v3 = vrot.slane %v401_v23, 1  ;;  %v305_v35 = vunpack.c.l.bf16 %v2638_v24  ;;  %v2716_v24 = vld [vmem:[%s4659_s1 + $0x200] sm:$0xff]  ;;  %v2754_v59 = vld [vmem:[%s4659_s1 + $0x218] sm:$0xff]  ;;  %v2794_v37 = vld [vmem:[%s4659_s1 + $0x228] sm:$0xff] }
  0x37   :  { %v567_v9 = vrot.slane %v566_v13, 4  ;;  %v360_v33 = vadd.f32 %v359_v29, %v358_v14  ;;  %v586_v41 = vadd.f32 %v257_v60, %v241_v38  ;;  %v337_v39 = vunpack.c.l.bf16 %v2643_v25  ;;  %v2799_v57 = vld [vmem:[%s4658_s0 + $0x10] sm:$0xff]  ;;  %v2806_v38 = vld [vmem:[%s4659_s1 + $0x3a0] sm:$0xff]  ;;  %v2821_v14 = vld [vmem:[%s4659_s1 + $0x328] sm:$0xff] }
  0x38   :  { %v1058_v30 = vsel %vm1056_vm1, %v585_v1, %v377_v21  ;;  %v610_v8 = vrot.slane %v609_v19, 1  ;;  %v403_v43 = vadd.f32 %v402_v3, %v401_v23  ;;  %v379_v42 = vadd.f32 %v378_v34, %v161_v20  ;;  %v2784_v20 = vld [vmem:[%s4659_s1 + $0x2a8] sm:$0xff]  ;;  %v2789_v21 = vld [vmem:[%s4659_s1 + $0x220] sm:$0xff]  ;;  %v2845_v29 = vld [vmem:[%s4659_s1 + $0x238] sm:$0xff] }
  0x39   :  { %1153 = vmatprep.mubr.f32.mxu0 %v1058_v30  ;;  %v568_v15 = vadd.f32 %v567_v9, %v566_v13  ;;  %v361_v47 = vrot.slane %v360_v33, 2  ;;  %v587_v40 = vadd.f32 %v586_v41, %v273_v6  ;;  %v2019_v44 = vpack.c.bf16 %v849_v4, %v848_v10  ;;  %v2811_v1 = vld [vmem:[%s4659_s1 + $0x3a8] sm:$0xff]  ;;  %v2816_v12 = vld [vmem:[%s4659_s1 + $0x320] sm:$0xff]  ;;  %v2835_v30 = vld [vmem:[%s4659_s1 + $0x2b8] sm:$0xff] }
  0x3a   :  { %v611_v46 = vadd.f32 %v610_v8, %v609_v19  ;;  %v209_v27 = vunpack.c.l.bf16 %v2622_v16  ;;  %v380_v54 = vadd.f32 %v379_v42, %v177_v26  ;;  %v2051_v28 = vpack.c.bf16 %v881_v18, %v880_v17  ;;  %v2840_v19 = vld [vmem:[%s4659_s1 + $0x230] sm:$0xff]  ;;  %v2855_v3 = vld [vmem:[%s4659_s1 + $0x3b8] sm:$0xff]  ;;  %v2872_v8 = vld [vmem:[%s4659_s1 + $0x2c0] sm:$0xff] }
  0x3b   :  { %v569_v25 = vrot.slane %v568_v15, 2  ;;  %v362_v16 = vadd.f32 %v361_v47, %v360_v33  ;;  %v321_v52 = vunpack.c.l.bf16 %v2651_v36  ;;  %v588_v56 = vadd.f32 %v587_v40, %v289_v32  ;;  %2020 = vmatprep.subr.bf16.mxu0 %v2019_v44  ;;  %v2764_v36 = vld [vmem:[%s4659_s1 + $0x398] sm:$0xff]  ;;  %v2850_v6 = vld [vmem:[%s4659_s1 + $0x3b0] sm:$0xff]  ;;  %v2877_v33 = vld [vmem:[%s4659_s1 + $0x2c8] sm:$0xff] }
  0x3c   :  { %v1060_v55 = vsel %vm1056_vm1, %v611_v46, %v403_v43  ;;  %v381_v31 = vadd.f32 %v380_v54, %v193_v61  ;;  %2052 = vmatprep.subr.bf16.mxu1 %v2051_v28  ;;  %v383_v11 = vsel %vm356_vm0, %v225_v62, 0.0  ;;  %v591_v26 = vsel %vm356_vm0, %v337_v39, 0.0  ;;  %v2830_v62 = vld [vmem:[%s4659_s1 + $0x2b0] sm:$0xff]  ;;  %v2867_v4 = vld [vmem:[%s4659_s1 + $0x338] sm:$0xff]  ;;  %v2887_v41 = vld [vmem:[%s4659_s1 + $0x248] sm:$0xff] }
  0x3d   :  { %1223 = vmatprep.mubr.f32.mxu1 %v1060_v55  ;;  %v570_v0 = vadd.f32 %v569_v25, %v568_v15  ;;  %v363_v7 = vrot.slane %v362_v16, 1  ;;  %v589_v22 = vadd.f32 %v588_v56, %v305_v35  ;;  %v2021_v13 = vpack.c.bf16 %v2721_v48, %v2716_v24  ;;  %v2862_v10 = vld [vmem:[%s4659_s1 + $0x330] sm:$0xff]  ;;  %4713 = vst [vmem:[#allocation6_spill] sm:$0xff] %v2867_v4  ;;  %v2882_v35 = vld [vmem:[%s4659_s1 + $0x240] sm:$0xff]  ;;  %v2902_v46 = vld [vmem:[%s4659_s1 + $0x3c8] sm:$0xff] }
  0x3e   :  { %v382_v23 = vadd.f32 %v381_v31, %v209_v27  ;;  %v2023_v34 = vpack.c.bf16 %v2742_v53, %v2737_v63  ;;  %4712 = vst [vmem:[#allocation5_spill] sm:$0xff] %v2862_v10  ;;  %v2897_v42 = vld [vmem:[%s4659_s1 + $0x3c0] sm:$0xff]  ;;  %4715 = vst [vmem:[#allocation8_spill] sm:$0xff] %v2902_v46  ;;  %v2912_v40 = vld [vmem:[%s4659_s1 + $0x348] sm:$0xff]  ;;  %v4737_v46 = vunpack.c.h.bf16 %v2799_v57  ;;  %v4738_v4 = vpack.c.bf16 %v2835_v30, %v2830_v62 }
  0x3f   :  { %v571_v60 = vrot.slane %v570_v0, 1  ;;  %v364_v9 = vadd.f32 %v363_v7, %v362_v16  ;;  %v590_v32 = vadd.f32 %v589_v22, %v321_v52  ;;  %4714 = vst [vmem:[#allocation7_spill] sm:$0xff] %v2897_v42  ;;  %v2907_v47 = vld [vmem:[%s4659_s1 + $0x340] sm:$0xff]  ;;  %4717 = vst [vmem:[#allocation10_spill] sm:$0xff] %v2912_v40  ;;  %v2917_v44 = vld [vmem:[%s4659_s1 + $0x2d0] sm:$0xff]  ;;  %v4739_v30 = vpack.c.bf16 %v2845_v29, %v2840_v19 }
  0x40   :  { %v384_v43 = vadd.f32 %v383_v11, %v382_v23  ;;  %4716 = vst [vmem:[#allocation9_spill] sm:$0xff] %v2907_v47  ;;  %v2922_v24 = vld [vmem:[%s4659_s1 + $0x2d8] sm:$0xff]  ;;  %v2933_v28 = vld [vmem:[%s4659_s1 + $0x250] sm:$0xff]  ;;  %v2968_v11 = vld [vmem:[%s4659_s1 + $0x2e0] sm:$0xff]  ;;  %v4742_v29 = vpack.c.bf16 %v2764_v36, %v2759_v50 }
  0x41   :  { %v572_v18 = vadd.f32 %v571_v60, %v570_v0  ;;  %v592_v48 = vadd.f32 %v591_v26, %v590_v32  ;;  %v2938_v63 = vld [vmem:[%s4659_s1 + $0x258] sm:$0xff]  ;;  %v2943_v53 = vld [vmem:[%s4659_s1 + $0x3d0] sm:$0xff]  ;;  %v2973_v22 = vld [vmem:[%s4659_s1 + $0x2e8] sm:$0xff] }
  0x42   :  { %4718 = vst [vmem:[#allocation11_spill] sm:$0xff] %v2943_v53  ;;  %v2948_v55 = vld [vmem:[%s4659_s1 + $0x3d8] sm:$0xff]  ;;  %v2953_v16 = vld [vmem:[%s4659_s1 + $0x350] sm:$0xff]  ;;  %v385_v0 = vrot.slane %v384_v43, 4  ;;  %v2978_v26 = vld [vmem:[%s4659_s1 + $0x260] sm:$0xff] }
  0x43   :  { %4719 = vst [vmem:[#allocation12_spill] sm:$0xff] %v2948_v55  ;;  %4720 = vst [vmem:[#allocation13_spill] sm:$0xff] %v2953_v16  ;;  %v2958_v52 = vld [vmem:[%s4659_s1 + $0x358] sm:$0xff]  ;;  %v1057_v56 = vsel %vm1056_vm1, %v572_v18, %v364_v9  ;;  %v2983_v60 = vld [vmem:[%s4659_s1 + $0x268] sm:$0xff]  ;;  %v593_v23 = vrot.slane %v592_v48, 4 }
  0x44   :  { %4721 = vst [vmem:[#allocation14_spill] sm:$0xff] %v2958_v52  ;;  %4722 = vst [vmem:[#allocation15_spill] sm:$0xff] %v2978_v26  ;;  %1154 = vmatmul.mubr.f32.vlgmr.msra.gmra.mrb[0].mxu0 %v1057_v56  ;;  %v2994_v7 = vld [vmem:[%s4659_s1 + $0x3e0] sm:$0xff]  ;;  %v2999_v31 = vld [vmem:[%s4659_s1 + $0x3e8] sm:$0xff]  ;;  %v386_v25 = vadd.f32 %v385_v0, %v384_v43  ;;  %v4734_v0 = vpack.c.bf16 %v2754_v59, %v2749_v58  ;;  %v131_v26 = vunpack.c.l.bf16 %v2799_v57 }
  0x45   :  { %4723 = vst [vmem:[#allocation16_spill] sm:$0xff] %v2983_v60  ;;  %4724 = vst [vmem:[#allocation17_spill] sm:$0xff] %v2994_v7  ;;  %v3004_v56 = vld [vmem:[%s4659_s1 + $0x360] sm:$0xff]  ;;  %2022 = vmatpush3.bf16.msra.mxu0 %v2021_v13  ;;  %v3015_v32 = vld [vmem:[%s4659_s1 + $0x368] sm:$0xff]  ;;  %v594_v43 = vadd.f32 %v593_v23, %v592_v48 }
  0x46   :  { %4725 = vst [vmem:[#allocation18_spill] sm:$0xff] %v2999_v31  ;;  %4726 = vst [vmem:[#allocation19_spill] sm:$0xff] %v3004_v56  ;;  %v3020_v9 = vld [vmem:[%s4659_s1 + $0x2f0] sm:$0xff]  ;;  %v3025_v13 = vld [vmem:[%s4659_s1 + $0x2f8] sm:$0xff]  ;;  %2024 = vmatprep.subr.bf16.mxu0 %v2023_v34  ;;  %v387_v48 = vrot.slane %v386_v25, 2 }
  0x47   :  { %4727 = vst [vmem:[#allocation20_spill] sm:$0xff] %v3015_v32  ;;  %4728 = vst [vmem:[#allocation21_spill] sm:$0xff] %v3020_v9  ;;  %v3036_v39 = vld [vmem:[%s4659_s1 + $0x270] sm:$0xff]  ;;  %v3041_v17 = vld [vmem:[%s4659_s1 + $0x278] sm:$0xff]  ;;  %v595_v27 = vrot.slane %v594_v43, 2 }
  0x48   :  { %4729 = vst [vmem:[#allocation22_spill] sm:$0xff] %v3025_v13  ;;  %4730 = vst [vmem:[#allocation23_spill] sm:$0xff] %v3036_v39  ;;  %v3046_v34 = vld [vmem:[%s4658_s0 + $0x50] sm:$0xff]  ;;  %v3062_v54 = vld [vmem:[%s4659_s1 + $0x3f8] sm:$0xff]  ;;  %v388_v53 = vadd.f32 %v387_v48, %v386_v25  ;;  %v4736_v39 = vpack.c.bf16 %v2794_v37, %v2789_v21 }
  0x49   :  { %4731 = vst [vmem:[#allocation24_spill] sm:$0xff] %v3041_v17  ;;  %v3057_v61 = vld [vmem:[%s4659_s1 + $0x3f0] sm:$0xff]  ;;  %4733 = vst [vmem:[#allocation26_spill] sm:$0xff] %v3062_v54  ;;  %2026 = vmatpush3.bf16.msra.mxu0 %v4734_v0  ;;  %v148_v59 = vunpack.c.h.bf16 %v3046_v34  ;;  %v596_v25 = vadd.f32 %v595_v27, %v594_v43  ;;  %v4735_v0 = vpack.c.bf16 %v2784_v20, %v2779_v51  ;;  %v147_v60 = vunpack.c.l.bf16 %v3046_v34 }
  0x4a   :  { %4732 = vst [vmem:[#allocation25_spill] sm:$0xff] %v3057_v61  ;;  %v3067_v23 = vld [vmem:[%s4658_s0 + $0x1d0] sm:$0xff]  ;;  %v389_v32 = vrot.slane %v388_v53, 1 }
  0x4b   :  { %v3078_v16 = vld [vmem:[%s4658_s0 + $0x90] sm:$0xff]  ;;  %2028 = vmatprep.subr.bf16.mxu0 %v4735_v0  ;;  %v244_v56 = vunpack.c.h.bf16 %v3067_v23  ;;  %v597_v48 = vrot.slane %v596_v25, 1  ;;  %v417_v9 = vadd.f32 %v148_v59, %v4737_v46 }
  0x4c   :  { %v3083_v52 = vld [vmem:[%s4658_s0 + $0x210] sm:$0xff]  ;;  %v164_v43 = vunpack.c.h.bf16 %v3078_v16  ;;  %v390_v40 = vadd.f32 %v389_v32, %v388_v53  ;;  %v163_v62 = vunpack.c.l.bf16 %v3078_v16 }
  0x4d   :  { %v3088_v18 = vld [vmem:[%s4658_s0 + $0x250] sm:$0xff]  ;;  %v260_v0 = vunpack.c.h.bf16 %v3083_v52  ;;  %2030 = vmatpush3.bf16.msra.mxu0 %v4736_v39  ;;  %v598_v10 = vadd.f32 %v597_v48, %v596_v25  ;;  %v259_v57 = vunpack.c.l.bf16 %v3083_v52 }
  0x4e   :  { %v3100_v31 = vld [vmem:[%s4658_s0 + $0xd0] sm:$0xff]  ;;  %v276_v15 = vunpack.c.h.bf16 %v3088_v18  ;;  %2032 = vmatprep.subr.bf16.mxu0 %v4738_v4  ;;  %v418_v39 = vadd.f32 %v417_v9, %v164_v43  ;;  %v3252_v43 = vld [vmem:[%s4658_s0 + $0x118] sm:$0xff] }
  0x4f   :  { %v3105_v55 = vld [vmem:[%s4658_s0 + $0x110] sm:$0xff]  ;;  %v180_v61 = vunpack.c.h.bf16 %v3100_v31  ;;  %v625_v13 = vadd.f32 %v260_v0, %v244_v56  ;;  %v1059_v46 = vsel %vm1056_vm1, %v598_v10, %v390_v40  ;;  %v4740_v10 = vpack.c.bf16 %v2732_v49, %v2726_v45 }
  0x50   :  { %v3110_v58 = vld [vmem:[%s4658_s0 + $0x190] sm:$0x11]  ;;  %v196_v54 = vunpack.c.h.bf16 %v3105_v55  ;;  %1224 = vmatmul.mubr.f32.vlgmr.msra.gmra.mrb[0].mxu1 %v1059_v46  ;;  %v179_v16 = vunpack.c.l.bf16 %v3100_v31  ;;  %v195_v45 = vunpack.c.l.bf16 %v3105_v55  ;;  %v404_v49 = vadd.f32 %v147_v60, %v131_v26  ;;  %v3205_v55 = vld [vmem:[%s4658_s0 + $0x18] sm:$0xff] }
  0x51   :  { %v3123_v7 = vld [vmem:[%s4658_s0 + $0x290] sm:$0xff]  ;;  %v228_v47 = vunpack.c.h.bf16 %v3110_v58  ;;  %v626_v32 = vadd.f32 %v625_v13, %v276_v15  ;;  %2034 = vmatpush3.bf16.msra.mxu0 %v4739_v30  ;;  %v419_v4 = vadd.f32 %v418_v39, %v180_v61  ;;  %v243_v15 = vunpack.c.l.bf16 %v3067_v23  ;;  %2054 = vmatpush3.bf16.msra.mxu1 %v4740_v10  ;;  %v3219_v23 = vld [vmem:[%s4658_s0 + $0x1d8] sm:$0xff] }
  0x52   :  { %v3129_v27 = vld [vmem:[%s4658_s0 + $0x150] sm:$0xff]  ;;  %v292_v42 = vunpack.c.h.bf16 %v3123_v7  ;;  %v227_v19 = vunpack.c.l.bf16 %v3110_v58  ;;  %v275_v61 = vunpack.c.l.bf16 %v3088_v18  ;;  %2056 = vmatprep.subr.bf16.mxu1 %v4742_v29  ;;  %v291_v50 = vunpack.c.l.bf16 %v3123_v7  ;;  %v3214_v7 = vld [vmem:[%s4658_s0 + $0x58] sm:$0xff] }
  0x53   :  { %v3134_v51 = vld [vmem:[%s4658_s0 + $0x2d0] sm:$0xff]  ;;  %v212_v53 = vunpack.c.h.bf16 %v3129_v27  ;;  %v422_v59 = vsel %vm356_vm0, %v228_v47, 0.0  ;;  %v4741_v47 = vpack.c.bf16 %v2877_v33, %v2872_v8  ;;  %v3192_v8 = vld [vmem:[%s4659_s1 + $0x480] sm:$0xff]  ;;  %v3197_v33 = vld [vmem:[%s4659_s1 + $0x488] sm:$0xff]  ;;  %v211_v31 = vunpack.c.l.bf16 %v3129_v27 }
  0x54   :  { %v3139_v20 = vld [vmem:[%s4658_s0 + $0x350] sm:$0x11]  ;;  %v308_v21 = vunpack.c.h.bf16 %v3134_v51  ;;  %v627_v9 = vadd.f32 %v626_v32, %v292_v42  ;;  %v420_v42 = vadd.f32 %v419_v4, %v196_v54  ;;  %v612_v54 = vadd.f32 %v259_v57, %v243_v15 }
  0x55   :  { %v3153_v17 = vld [vmem:[%s4658_s0 + $0x310] sm:$0xff]  ;;  %v340_v37 = vunpack.c.h.bf16 %v3139_v20  ;;  %2036 = vmatprep.subr.bf16.mxu0 %v4741_v47  ;;  %v339_v36 = vunpack.c.l.bf16 %v3139_v20  ;;  %v4743_v26 = vpack.c.bf16 %v2887_v41, %v2882_v35  ;;  %v307_v13 = vunpack.c.l.bf16 %v3134_v51  ;;  %v3234_v51 = vld [vmem:[%s4658_s0 + $0x218] sm:$0xff] }
  0x56   :  { %v324_v56 = vunpack.c.h.bf16 %v3153_v17  ;;  %v628_v52 = vadd.f32 %v627_v9, %v308_v21  ;;  %v421_v60 = vadd.f32 %v420_v42, %v212_v53  ;;  %v405_v34 = vadd.f32 %v404_v49, %v163_v62  ;;  %v3247_v20 = vld [vmem:[%s4658_s0 + $0xd8] sm:$0xff] }
  0x57   :  { %v630_v40 = vsel %vm356_vm0, %v340_v37, 0.0  ;;  %2038 = vmatpush3.bf16.msra.mxu0 %v4743_v26  ;;  %v4744_v58 = vpack.c.bf16 %v2774_v2, %v2769_v5  ;;  %v4745_v35 = vpack.c.bf16 %v2922_v24, %v2917_v44  ;;  %v323_v41 = vunpack.c.l.bf16 %v3153_v17  ;;  %v3242_v17 = vld [vmem:[%s4658_s0 + $0x98] sm:$0xff]  ;;  %v4755_v26 = vld [vmem:[#allocation5_spill] sm:$0xff] }
  0x58   :  { %v629_v18 = vadd.f32 %v628_v52, %v324_v56  ;;  %v409_v25 = vsel %vm356_vm0, %v227_v19, 0.0  ;;  %v613_v48 = vadd.f32 %v612_v54, %v275_v61  ;;  %v2083_v27 = vpack.c.bf16 %v3197_v33, %v3192_v8  ;;  %v3259_v53 = vld [vmem:[%s4658_s0 + $0x258] sm:$0xff]  ;;  %v4754_v54 = vld [vmem:[#allocation6_spill] sm:$0xff] }
  0x59   :  { %2058 = vmatpush3.bf16.msra.mxu1 %v4744_v58  ;;  %2040 = vmatprep.subr.bf16.mxu0 %v4745_v35  ;;  %v4746_v5 = vpack.c.bf16 %v2811_v1, %v2806_v38  ;;  %v423_v2 = vadd.f32 %v422_v59, %v421_v60  ;;  %v406_v24 = vadd.f32 %v405_v34, %v179_v16  ;;  %v134_v38 = vunpack.c.h.bf16 %v3205_v55  ;;  %v3269_v59 = vld [vmem:[%s4658_s0 + $0x158] sm:$0xff] }
  0x5a   :  { %v631_v44 = vadd.f32 %v630_v40, %v629_v18  ;;  %v614_v1 = vadd.f32 %v613_v48, %v291_v50  ;;  %v617_v0 = vsel %vm356_vm0, %v339_v36, 0.0  ;;  %v150_v21 = vunpack.c.h.bf16 %v3214_v7  ;;  %v3274_v62 = vld [vmem:[%s4658_s0 + $0x298] sm:$0xff]  ;;  %v4757_v18 = vld [vmem:[#allocation22_spill] sm:$0xff] }
  0x5b   :  { %2060 = vmatprep.subr.bf16.mxu1 %v4746_v5  ;;  %v246_v37 = vunpack.c.h.bf16 %v3219_v23  ;;  %v4747_v39 = vpack.c.bf16 %v2938_v63, %v2933_v28  ;;  %v424_v32 = vrot.slane %v423_v2, 4  ;;  %v407_v56 = vadd.f32 %v406_v24, %v195_v45  ;;  %v4751_v61 = vld [vmem:[#allocation16_spill] sm:$0xff]  ;;  %v4752_v29 = vld [vmem:[#allocation15_spill] sm:$0xff] }
  0x5c   :  { %v632_v46 = vrot.slane %v631_v44, 4  ;;  %v262_v30 = vunpack.c.h.bf16 %v3234_v51  ;;  %v4748_v4 = vpack.c.bf16 %v2821_v14, %v2816_v12  ;;  %v4749_v28 = vpack.c.bf16 %v2973_v22, %v2968_v11  ;;  %v3292_v12 = vld [vmem:[%s4658_s0 + $0x198] sm:$0x11] }
  0x5d   :  { %2042 = vmatpush3.bf16.msra.mxu0 %v4747_v39  ;;  %v615_v63 = vadd.f32 %v614_v1, %v307_v13  ;;  %v166_v9 = vunpack.c.h.bf16 %v3242_v17  ;;  %v182_v15 = vunpack.c.h.bf16 %v3247_v20  ;;  %v198_v57 = vunpack.c.h.bf16 %v3252_v43  ;;  %v3297_v14 = vld [vmem:[%s4658_s0 + $0x2d8] sm:$0xff]  ;;  %v4758_v13 = vld [vmem:[#allocation21_spill] sm:$0xff] }
  0x5e   :  { %2062 = vmatpush3.bf16.msra.mxu1 %v4748_v4  ;;  %2044 = vmatprep.subr.bf16.mxu0 %v4749_v28  ;;  %v4750_v10 = vpack.c.bf16 %v2855_v3, %v2850_v6  ;;  %v425_v47 = vadd.f32 %v424_v32, %v423_v2  ;;  %v633_v40 = vadd.f32 %v632_v46, %v631_v44  ;;  %v278_v11 = vunpack.c.h.bf16 %v3259_v53  ;;  %v3313_v50 = vld [vmem:[%s4658_s0 + $0x358] sm:$0x11]  ;;  %v3329_v44 = vld [vmem:[%s4659_s1 + $0x370] sm:$0xff] }
  0x5f   :  { %v408_v16 = vadd.f32 %v407_v56, %v211_v31  ;;  %v616_v22 = vadd.f32 %v615_v63, %v323_v41  ;;  %v214_v19 = vunpack.c.h.bf16 %v3269_v59  ;;  %v294_v6 = vunpack.c.h.bf16 %v3274_v62  ;;  %v3308_v31 = vld [vmem:[%s4658_s0 + $0x318] sm:$0xff] }
  0x60   :  { %2064 = vmatprep.subr.bf16.mxu1 %v4750_v10  ;;  %v443_v3 = vadd.f32 %v150_v21, %v134_v38  ;;  %v4753_v42 = vpack.c.bf16 %v4751_v61, %v4752_v29  ;;  %v426_v52 = vrot.slane %v425_v47, 2  ;;  %v634_v45 = vrot.slane %v633_v40, 2  ;;  %v4760_v48 = vld [vmem:[#allocation8_spill] sm:$0xff]  ;;  %v4761_v5 = vld [vmem:[#allocation7_spill] sm:$0xff] }
  0x61   :  { %v410_v49 = vadd.f32 %v409_v25, %v408_v16  ;;  %v651_v36 = vadd.f32 %v262_v30, %v246_v37  ;;  %v4756_v60 = vpack.c.bf16 %v4754_v54, %v4755_v26  ;;  %v4759_v34 = vpack.c.bf16 %v4757_v18, %v4758_v13  ;;  %v3334_v24 = vld [vmem:[%s4659_s1 + $0x378] sm:$0xff]  ;;  %v4766_v16 = vld [vmem:[#allocation10_spill] sm:$0xff]  ;;  %v3363_v29 = vld [vmem:[%s4659_s1 + $0x580] sm:$0xff] }
  0x62   :  { %2046 = vmatpush3.bf16.msra.mxu0 %v4753_v42  ;;  %v618_v58 = vadd.f32 %v617_v0, %v616_v22  ;;  %v230_v35 = vunpack.c.h.bf16 %v3292_v12  ;;  %v310_v41 = vunpack.c.h.bf16 %v3297_v14  ;;  %v444_v25 = vadd.f32 %v443_v3, %v166_v9  ;;  %v4763_v56 = vld [vmem:[#allocation24_spill] sm:$0xff]  ;;  %v4764_v30 = vld [vmem:[#allocation23_spill] sm:$0xff]  ;;  %v3368_v42 = vld [vmem:[%s4659_s1 + $0x588] sm:$0xff] }
  0x63   :  { %2066 = vmatpush3.bf16.msra.mxu1 %v4756_v60  ;;  %2048 = vmatprep.subr.bf16.mxu0 %v4759_v34  ;;  %v4762_v2 = vpack.c.bf16 %v4760_v48, %v4761_v5  ;;  %v427_v38 = vadd.f32 %v426_v52, %v425_v47  ;;  %v635_v1 = vadd.f32 %v634_v45, %v633_v40  ;;  %v411_v0 = vrot.slane %v410_v49, 4  ;;  %v3344_v47 = vld [vmem:[%s4659_s1 + $0x400] sm:$0xff]  ;;  %v3349_v40 = vld [vmem:[%s4659_s1 + $0x408] sm:$0xff]  ;;  %v4770_v45 = vld [vmem:[#allocation11_spill] sm:$0xff] }
  0x64   :  { %v652_v21 = vadd.f32 %v651_v36, %v278_v11  ;;  %v619_v37 = vrot.slane %v618_v58, 4  ;;  %v326_v39 = vunpack.c.h.bf16 %v3308_v31  ;;  %v342_v32 = vunpack.c.h.bf16 %v3313_v50  ;;  %v4769_v52 = vld [vmem:[#allocation12_spill] sm:$0xff] }
  0x65   :  { %2068 = vmatprep.subr.bf16.mxu1 %v4762_v2  ;;  %v445_v46 = vadd.f32 %v444_v25, %v182_v15  ;;  %v4765_v4 = vpack.c.bf16 %v4763_v56, %v4764_v30  ;;  %v428_v28 = vrot.slane %v427_v38, 1  ;;  %v636_v63 = vrot.slane %v635_v1, 1  ;;  %v4767_v15 = vld [vmem:[#allocation9_spill] sm:$0xff] }
  0x66   :  { %v412_v9 = vadd.f32 %v411_v0, %v410_v49  ;;  %v653_v10 = vadd.f32 %v652_v21, %v294_v6  ;;  %v4768_v11 = vpack.c.bf16 %v4766_v16, %v4767_v15  ;;  %v2081_v22 = vpack.c.bf16 %v3334_v24, %v3329_v44  ;;  %v4773_v25 = vld [vmem:[#allocation13_spill] sm:$0xff]  ;;  %v3479_v44 = vld [vmem:[%s4659_s1 + $0x4b8] sm:$0xff] }
  0x67   :  { %2050 = vmatpush3.bf16.msra.mxu0 %v4765_v4  ;;  %v620_v3 = vadd.f32 %v619_v37, %v618_v58  ;;  %v446_v6 = vadd.f32 %v445_v46, %v198_v57  ;;  %v448_v61 = vsel %vm356_vm0, %v230_v35, 0.0  ;;  %v4771_v49 = vpack.c.bf16 %v4769_v52, %v4770_v45  ;;  %v4772_v35 = vld [vmem:[#allocation14_spill] sm:$0xff]  ;;  %v4782_v15 = vld [vmem:[#allocation25_spill] sm:$0xff] }
  0x68   :  { %2070 = vmatpush3.bf16.msra.mxu1 %v4768_v11  ;;  %2084 = vmatprep.subr.bf16.mxu0 %v2083_v27  ;;  %v429_v36 = vadd.f32 %v428_v28, %v427_v38  ;;  %v637_v8 = vadd.f32 %v636_v63, %v635_v1  ;;  %v413_v33 = vrot.slane %v412_v9, 2  ;;  %v654_v27 = vadd.f32 %v653_v10, %v310_v41  ;;  %v4775_v38 = vld [vmem:[#allocation18_spill] sm:$0xff]  ;;  %v4776_v1 = vld [vmem:[#allocation17_spill] sm:$0xff]  ;;  %v4779_v10 = vld [vmem:[#allocation19_spill] sm:$0xff] }
  0x69   :  { %2072 = vmatprep.subr.bf16.mxu1 %v4771_v49  ;;  %v621_v57 = vrot.slane %v620_v3, 2  ;;  %v447_v54 = vadd.f32 %v446_v6, %v214_v19  ;;  %v656_v26 = vsel %vm356_vm0, %v342_v32, 0.0  ;;  %v2085_v60 = vpack.c.bf16 %v3349_v40, %v3344_v47 }
  0x6a   :  { %v1062_v18 = vsel %vm1056_vm1, %v637_v8, %v429_v36  ;;  %v414_v13 = vadd.f32 %v413_v33, %v412_v9  ;;  %v655_v34 = vadd.f32 %v654_v27, %v326_v39  ;;  %v2115_v58 = vpack.c.bf16 %v3368_v42, %v3363_v29  ;;  %v914_v9 = vld [vmem:[%s4659_s1 + $0x490] sm:$0xff]  ;;  %v3411_v29 = vld [vmem:[%s4659_s1 + $0x500] sm:$0xff]  ;;  %v3433_v8 = vld [vmem:[%s4659_s1 + $0x598] sm:$0xff] }
  0x6b   :  { %v4774_v48 = vpack.c.bf16 %v4772_v35, %v4773_v25  ;;  %1293 = vmatprep.mubr.f32.mxu0 %v1062_v18  ;;  %v622_v41 = vadd.f32 %v621_v57, %v620_v3  ;;  %v449_v5 = vadd.f32 %v448_v61, %v447_v54  ;;  %v133_v19 = vunpack.c.l.bf16 %v3205_v55  ;;  %v898_v42 = vld [vmem:[%s4659_s1 + $0x410] sm:$0xff]  ;;  %v3438_v33 = vld [vmem:[%s4659_s1 + $0x4a0] sm:$0xff]  ;;  %v3443_v27 = vld [vmem:[%s4659_s1 + $0x4a8] sm:$0xff] }
  0x6c   :  { %v149_v2 = vunpack.c.l.bf16 %v3214_v7  ;;  %v4777_v0 = vpack.c.bf16 %v4775_v38, %v4776_v1  ;;  %v415_v21 = vrot.slane %v414_v13, 1  ;;  %v657_v37 = vadd.f32 %v656_v26, %v655_v34  ;;  %v3428_v36 = vld [vmem:[%s4659_s1 + $0x590] sm:$0xff]  ;;  %v3455_v34 = vld [vmem:[%s4659_s1 + $0x518] sm:$0xff]  ;;  %v3460_v35 = vld [vmem:[%s4659_s1 + $0x420] sm:$0xff] }
  0x6d   :  { %2074 = vmatpush3.bf16.msra.mxu1 %v4774_v48  ;;  %v245_v39 = vunpack.c.l.bf16 %v3219_v23  ;;  %v261_v32 = vunpack.c.l.bf16 %v3234_v51  ;;  %v623_v46 = vrot.slane %v622_v41, 1  ;;  %v450_v56 = vrot.slane %v449_v5, 4  ;;  %v915_v23 = vld [vmem:[%s4659_s1 + $0x498] sm:$0xff]  ;;  %v3502_v38 = vld [vmem:[%s4659_s1 + $0x528] sm:$0xff]  ;;  %v3507_v1 = vld [vmem:[%s4659_s1 + $0x430] sm:$0xff] }
  0x6e   :  { %2076 = vmatprep.subr.bf16.mxu1 %v4777_v0  ;;  %v165_v30 = vunpack.c.l.bf16 %v3242_v17  ;;  %v181_v4 = vunpack.c.l.bf16 %v3247_v20  ;;  %v416_v28 = vadd.f32 %v415_v21, %v414_v13  ;;  %v658_v55 = vrot.slane %v657_v37, 4  ;;  %v4778_v51 = vld [vmem:[#allocation20_spill] sm:$0xff]  ;;  %v3450_v13 = vld [vmem:[%s4659_s1 + $0x510] sm:$0xff] }
  0x6f   :  { %v197_v7 = vunpack.c.l.bf16 %v3252_v43  ;;  %v277_v63 = vunpack.c.l.bf16 %v3259_v53  ;;  %v4780_v47 = vpack.c.bf16 %v4778_v51, %v4779_v10  ;;  %v624_v17 = vadd.f32 %v623_v46, %v622_v41  ;;  %v4781_v43 = vld [vmem:[#allocation26_spill] sm:$0xff]  ;;  %v3512_v0 = vld [vmem:[%s4659_s1 + $0x438] sm:$0xff]  ;;  %v3517_v21 = vld [vmem:[%s4658_s0 + $0x20] sm:$0xff] }
  0x70   :  { %v451_v20 = vadd.f32 %v450_v56, %v449_v5  ;;  %v229_v40 = vunpack.c.l.bf16 %v3292_v12  ;;  %v430_v16 = vadd.f32 %v149_v2, %v133_v19  ;;  %v4783_v53 = vpack.c.bf16 %v4781_v43, %v4782_v15  ;;  %v3416_v12 = vld [vmem:[%s4659_s1 + $0x508] sm:$0xff]  ;;  %v3474_v5 = vld [vmem:[%s4659_s1 + $0x4b0] sm:$0xff]  ;;  %v3487_v19 = vld [vmem:[%s4659_s1 + $0x5a0] sm:$0xff] }
  0x71   :  { %2078 = vmatpush3.bf16.msra.mxu1 %v4780_v47  ;;  %v659_v11 = vadd.f32 %v658_v55, %v657_v37  ;;  %v293_v3 = vunpack.c.l.bf16 %v3274_v62  ;;  %v341_v6 = vunpack.c.l.bf16 %v3313_v50  ;;  %v638_v61 = vadd.f32 %v261_v32, %v245_v39  ;;  %v899_v62 = vld [vmem:[%s4659_s1 + $0x418] sm:$0xff]  ;;  %v3469_v41 = vld [vmem:[%s4659_s1 + $0x428] sm:$0xff]  ;;  %v3525_v56 = vld [vmem:[%s4659_s1 + $0x5b0] sm:$0xff] }
  0x72   :  { %2080 = vmatprep.subr.bf16.mxu1 %v4783_v53  ;;  %v1061_v50 = vsel %vm1056_vm1, %v624_v17, %v416_v28  ;;  %v452_v52 = vrot.slane %v451_v20, 2  ;;  %v431_v45 = vadd.f32 %v430_v16, %v165_v30  ;;  %v2087_v49 = vpack.c.bf16 %v915_v23, %v914_v9  ;;  %v3492_v2 = vld [vmem:[%s4659_s1 + $0x5a8] sm:$0xff]  ;;  %v3530_v30 = vld [vmem:[%s4659_s1 + $0x5b8] sm:$0xff]  ;;  %v3545_v55 = vld [vmem:[%s4658_s0 + $0x60] sm:$0xff] }
  0x73   :  { %1294 = vmatmul.mubr.f32.vlgmr.msra.gmra.mrb[2].mxu0 %v1061_v50  ;;  %v660_v57 = vrot.slane %v659_v11, 2  ;;  %v213_v54 = vunpack.c.l.bf16 %v3269_v59  ;;  %v309_v26 = vunpack.c.l.bf16 %v3297_v14  ;;  %v639_v18 = vadd.f32 %v638_v61, %v277_v63  ;;  %v3540_v28 = vld [vmem:[%s4659_s1 + $0x538] sm:$0xff]  ;;  %v3554_v51 = vld [vmem:[%s4659_s1 + $0x4c0] sm:$0xff]  ;;  %v3559_v10 = vld [vmem:[%s4659_s1 + $0x4c8] sm:$0xff] }
  0x74   :  { %v453_v59 = vadd.f32 %v452_v52, %v451_v20  ;;  %2086 = vmatpush3.bf16.msra.mxu0 %v2085_v60  ;;  %v325_v14 = vunpack.c.l.bf16 %v3308_v31  ;;  %v432_v25 = vadd.f32 %v431_v45, %v181_v4  ;;  %v2089_v48 = vpack.c.bf16 %v899_v62, %v898_v42  ;;  %v3535_v4 = vld [vmem:[%s4659_s1 + $0x530] sm:$0xff]  ;;  %v3564_v47 = vld [vmem:[%s4659_s1 + $0x440] sm:$0xff]  ;;  %v3569_v17 = vld [vmem:[%s4659_s1 + $0x448] sm:$0xff] }
  0x75   :  { %2082 = vmatpush3.bf16.msra.mxu1 %v2081_v22  ;;  %v661_v24 = vadd.f32 %v660_v57, %v659_v11  ;;  %v435_v31 = vsel %vm356_vm0, %v229_v40, 0.0  ;;  %v640_v22 = vadd.f32 %v639_v18, %v293_v3  ;;  %2088 = vmatprep.subr.bf16.mxu0 %v2087_v49  ;;  %v2091_v60 = vpack.c.bf16 %v3443_v27, %v3438_v33  ;;  %v3574_v20 = vld [vmem:[%s4659_s1 + $0x5c0] sm:$0xff]  ;;  %v3579_v40 = vld [vmem:[%s4659_s1 + $0x5c8] sm:$0xff]  ;;  %v3596_v3 = vld [vmem:[%s4659_s1 + $0x4d0] sm:$0xff] }
  0x76   :  { %2116 = vmatprep.subr.bf16.mxu1 %v2115_v58  ;;  %v3497_v58 = vld [vmem:[%s4659_s1 + $0x520] sm:$0xff]  ;;  %v454_v37 = vrot.slane %v453_v59, 1  ;;  %v433_v39 = vadd.f32 %v432_v25, %v197_v7  ;;  %v643_v32 = vsel %vm356_vm0, %v341_v6, 0.0  ;;  %4784 = vst [vmem:[#allocation16_spill] sm:$0xff] %v3574_v20  ;;  %4785 = vst [vmem:[#allocation15_spill] sm:$0xff] %v3579_v40  ;;  %v2093_v15 = vpack.c.bf16 %v3469_v41, %v3460_v35  ;;  %v3591_v11 = vld [vmem:[%s4659_s1 + $0x548] sm:$0xff] }
  0x77   :  { %v662_v7 = vrot.slane %v661_v24, 1  ;;  %v641_v63 = vadd.f32 %v640_v22, %v309_v26  ;;  %v3586_v53 = vld [vmem:[%s4659_s1 + $0x540] sm:$0xff]  ;;  %4787 = vst [vmem:[#allocation5_spill] sm:$0xff] %v3591_v11  ;;  %v3601_v6 = vld [vmem:[%s4659_s1 + $0x4d8] sm:$0xff]  ;;  %v3606_v61 = vld [vmem:[%s4659_s1 + $0x450] sm:$0xff]  ;;  %v2095_v45 = vpack.c.bf16 %v3479_v44, %v3474_v5  ;;  %v2097_v25 = vpack.c.bf16 %v3512_v0, %v3507_v1 }
  0x78   :  { %v455_v16 = vadd.f32 %v454_v37, %v453_v59  ;;  %v434_v43 = vadd.f32 %v433_v39, %v213_v54  ;;  %2090 = vmatpush3.bf16.msra.mxu0 %v2089_v48  ;;  %4786 = vst [vmem:[#allocation6_spill] sm:$0xff] %v3586_v53  ;;  %v3611_v42 = vld [vmem:[%s4659_s1 + $0x458] sm:$0xff]  ;;  %v3619_v49 = vld [vmem:[%s4659_s1 + $0x5d0] sm:$0xff]  ;;  %v3639_v54 = vld [vmem:[%s4659_s1 + $0x4e0] sm:$0xff]  ;;  %v2099_v39 = vpack.c.bf16 %v3559_v10, %v3554_v51 }
  0x79   :  { %v663_v50 = vadd.f32 %v662_v7, %v661_v24  ;;  %v642_v52 = vadd.f32 %v641_v63, %v325_v14  ;;  %2092 = vmatprep.subr.bf16.mxu0 %v2091_v60  ;;  %4788 = vst [vmem:[#allocation22_spill] sm:$0xff] %v3619_v49  ;;  %v3624_v33 = vld [vmem:[%s4659_s1 + $0x5d8] sm:$0xff]  ;;  %v3629_v27 = vld [vmem:[%s4659_s1 + $0x550] sm:$0xff]  ;;  %v3644_v26 = vld [vmem:[%s4659_s1 + $0x4e8] sm:$0xff] }
  0x7a   :  { %4789 = vst [vmem:[#allocation21_spill] sm:$0xff] %v3624_v33  ;;  %4790 = vst [vmem:[#allocation8_spill] sm:$0xff] %v3629_v27  ;;  %v3634_v57 = vld [vmem:[%s4659_s1 + $0x558] sm:$0xff]  ;;  %v436_v35 = vadd.f32 %v435_v31, %v434_v43  ;;  %v3656_v48 = vld [vmem:[%s4659_s1 + $0x460] sm:$0xff]  ;;  %v2105_v43 = vpack.c.bf16 %v3611_v42, %v3606_v61  ;;  %v2107_v61 = vpack.c.bf16 %v3644_v26, %v3639_v54 }
  0x7b   :  { %4791 = vst [vmem:[#allocation7_spill] sm:$0xff] %v3634_v57  ;;  %v3661_v41 = vld [vmem:[%s4659_s1 + $0x468] sm:$0xff]  ;;  %v3666_v5 = vld [vmem:[%s4659_s1 + $0x5e0] sm:$0xff]  ;;  %v1064_v44 = vsel %vm1056_vm1, %v663_v50, %v455_v16  ;;  %v644_v24 = vadd.f32 %v643_v32, %v642_v52  ;;  %v2101_v32 = vpack.c.bf16 %v3569_v17, %v3564_v47  ;;  %v3697_v63 = vld [vmem:[%s4659_s1 + $0x4f0] sm:$0xff]  ;;  %v2103_v17 = vpack.c.bf16 %v3601_v6, %v3596_v3 }
  0x7c   :  { %4792 = vst [vmem:[#allocation24_spill] sm:$0xff] %v3666_v5  ;;  %v3676_v60 = vld [vmem:[%s4659_s1 + $0x5e8] sm:$0xff]  ;;  %v3681_v1 = vld [vmem:[%s4659_s1 + $0x560] sm:$0xff]  ;;  %1363 = vmatprep.mubr.f32.mxu1 %v1064_v44  ;;  %v437_v37 = vrot.slane %v436_v35, 4  ;;  %2094 = vmatpush3.bf16.msra.mxu0 %v2093_v15  ;;  %v3702_v16 = vld [vmem:[%s4659_s1 + $0x4f8] sm:$0xff] }
  0x7d   :  { %4793 = vst [vmem:[#allocation23_spill] sm:$0xff] %v3676_v60  ;;  %4794 = vst [vmem:[#allocation10_spill] sm:$0xff] %v3681_v1  ;;  %v3686_v0 = vld [vmem:[%s4659_s1 + $0x568] sm:$0xff]  ;;  %v3707_v51 = vld [vmem:[%s4659_s1 + $0x470] sm:$0xff]  ;;  %v645_v10 = vrot.slane %v644_v24, 4  ;;  %2096 = vmatprep.subr.bf16.mxu0 %v2095_v45 }
  0x7e   :  { %4795 = vst [vmem:[#allocation9_spill] sm:$0xff] %v3686_v0  ;;  %v3718_v15 = vld [vmem:[%s4659_s1 + $0x478] sm:$0xff]  ;;  %v3723_v50 = vld [vmem:[%s4659_s1 + $0x5f0] sm:$0xff]  ;;  %v438_v45 = vadd.f32 %v437_v37, %v436_v35  ;;  %v3739_v42 = vld [vmem:[%s4658_s0 + $0xa0] sm:$0xff] }
  0x7f   :  { %4796 = vst [vmem:[#allocation12_spill] sm:$0xff] %v3723_v50  ;;  %v3728_v52 = vld [vmem:[%s4659_s1 + $0x5f8] sm:$0xff]  ;;  %v3744_v44 = vld [vmem:[%s4658_s0 + $0x1e0] sm:$0xff]  ;;  %v646_v37 = vadd.f32 %v645_v10, %v644_v24  ;;  %v168_v54 = vunpack.c.h.bf16 %v3739_v42 }
  0x80   :  { %4797 = vst [vmem:[#allocation11_spill] sm:$0xff] %v3728_v52  ;;  %v3749_v35 = vld [vmem:[%s4658_s0 + $0x220] sm:$0xff]  ;;  %v439_v10 = vrot.slane %v438_v45, 2  ;;  %2098 = vmatpush3.bf16.msra.mxu0 %v2097_v25  ;;  %v248_v59 = vunpack.c.h.bf16 %v3744_v44  ;;  %v4799_v52 = vunpack.c.h.bf16 %v3545_v55 }
  0x81   :  { %v3760_v3 = vld [vmem:[%s4658_s0 + $0xe0] sm:$0xff]  ;;  %v647_v25 = vrot.slane %v646_v37, 2  ;;  %2100 = vmatprep.subr.bf16.mxu0 %v2099_v39  ;;  %v264_v23 = vunpack.c.h.bf16 %v3749_v35 }
  0x82   :  { %v3765_v47 = vld [vmem:[%s4658_s0 + $0x120] sm:$0xff]  ;;  %v440_v26 = vadd.f32 %v439_v10, %v438_v45  ;;  %v184_v9 = vunpack.c.h.bf16 %v3760_v3  ;;  %v4798_v10 = vunpack.c.h.bf16 %v3517_v21 }
  0x83   :  { %v3770_v24 = vld [vmem:[%s4658_s0 + $0x260] sm:$0xff]  ;;  %v200_v46 = vunpack.c.h.bf16 %v3765_v47  ;;  %v648_v62 = vadd.f32 %v647_v25, %v646_v37 }
  0x84   :  { %v3781_v22 = vld [vmem:[%s4658_s0 + $0x1a0] sm:$0x11]  ;;  %v280_v18 = vunpack.c.h.bf16 %v3770_v24  ;;  %v469_v1 = vadd.f32 %v4799_v52, %v4798_v10 }
  0x85   :  { %v3786_v31 = vld [vmem:[%s4658_s0 + $0x360] sm:$0x11]  ;;  %v232_v50 = vunpack.c.h.bf16 %v3781_v22 }
  0x86   :  { %v3791_v14 = vld [vmem:[%s4658_s0 + $0x160] sm:$0xff]  ;;  %v344_v45 = vunpack.c.h.bf16 %v3786_v31 }
  0x87   :  { %v3796_v7 = vld [vmem:[%s4658_s0 + $0x2a0] sm:$0xff] }
  0x88   :  { %v3804_v39 = vld [vmem:[%s4658_s0 + $0x2e0] sm:$0xff] }
  0x89   :  { %v3809_v6 = vld [vmem:[%s4658_s0 + $0x320] sm:$0xff] }
  0x8a   :  { %8 = vsyncpa [#allocation3], 0  ;;  %v441_v0 = vrot.slane %v440_v26, 1  ;;  %2102 = vmatpush3.bf16.msra.mxu0 %v2101_v32  ;;  %v216_v5 = vunpack.c.h.bf16 %v3791_v14  ;;  %v296_v60 = vunpack.c.h.bf16 %v3796_v7  ;;  %v677_v27 = vadd.f32 %v264_v23, %v248_v59  ;;  %s2236_s19 = smov [#allocation2]  }
  0x8b   :  { %v649_v57 = vrot.slane %v648_v62, 1  ;;  %2104 = vmatprep.subr.bf16.mxu0 %v2103_v17  ;;  %v312_v37 = vunpack.c.h.bf16 %v3804_v39  ;;  %v328_v25 = vunpack.c.h.bf16 %v3809_v6  ;;  %v470_v49 = vadd.f32 %v469_v1, %v168_v54  ;;  %s1666_s20 = sshll.u32 %s2236_s19, 4  ;;  %s1667_s20 = int_to_ptr.vmem [resolvable:$true] %s1666_s20 }
  0x8c   :  { %v442_v33 = vadd.f32 %v441_v0, %v440_v26  ;;  %v678_v53 = vadd.f32 %v677_v27, %v280_v18  ;;  %v135_v11 = vunpack.c.l.bf16 %v3517_v21  ;;  %v151_v52 = vunpack.c.l.bf16 %v3545_v55  ;;  %v976_v18 = vld [vmem:[%s4659_s1 + $0x680] sm:$0xff]  ;;  %v3897_v26 = vld [vmem:[%s4658_s0 + $0x128] sm:$0xff]  ;;  %s2212_s21 = scalar_lea.vmem %s1667_s20, 32  ;;  %p2217_p1 = scmp.lt.s32.totalorder %s1667_s20, %s1667_s20 }
  0x8d   :  { %v650_v10 = vadd.f32 %v649_v57, %v648_v62  ;;  %v471_v32 = vadd.f32 %v470_v49, %v184_v9  ;;  %v474_v20 = vsel %vm356_vm0, %v232_v50, 0.0  ;;  %v682_v40 = vsel %vm356_vm0, %v344_v45, 0.0  ;;  %p2213_p0 = scmp.ne.s32.totalorder %s1667_s20, %s2212_s21  ;;  %p2218_p2 = scmp.lt.s32.totalorder %s2212_s21, %s2212_s21 }
  0x8e   :  { %2106 = vmatpush3.bf16.msra.mxu0 %v2105_v43  ;;  %v679_v23 = vadd.f32 %v678_v53, %v296_v60  ;;  %v167_v59 = vunpack.c.l.bf16 %v3739_v42  ;;  %v247_v17 = vunpack.c.l.bf16 %v3744_v44  ;;  %v263_v1 = vunpack.c.l.bf16 %v3749_v35 }
  0x8f   :  { %v1063_v27 = vsel %vm1056_vm1, %v650_v10, %v442_v33  ;;  %2108 = vmatprep.subr.bf16.mxu0 %v2107_v61  ;;  %v472_v21 = vadd.f32 %v471_v32, %v200_v46  ;;  %v183_v55 = vunpack.c.l.bf16 %v3760_v3  ;;  %v279_v9 = vunpack.c.l.bf16 %v3770_v24  ;;  %v977_v33 = vld [vmem:[%s4659_s1 + $0x688] sm:$0xff]  ;;  %p2219_p3 = por %p2218_p2, %p2217_p1 }
  0x90   :  { %1364 = vmatmul.mubr.f32.vlgmr.msra.gmra.mrb[2].mxu1 %v1063_v27  ;;  %v680_v62 = vadd.f32 %v679_v23, %v312_v37  ;;  %v231_v49 = vunpack.c.l.bf16 %v3781_v22  ;;  %v343_v53 = vunpack.c.l.bf16 %v3786_v31  ;;  %v456_v57 = vadd.f32 %v151_v52, %v135_v11  ;;  %v3877_v61 = vld [vmem:[%s4658_s0 + $0x228] sm:$0xff] }
  0x91   :  { %v4800_v46 = vpack.c.bf16 %v3416_v12, %v3411_v29  ;;  %v473_v60 = vadd.f32 %v472_v21, %v216_v5  ;;  %v199_v0 = vunpack.c.l.bf16 %v3765_v47  ;;  %v295_v22 = vunpack.c.l.bf16 %v3796_v7  ;;  %v3858_v5 = vld [vmem:[%s4658_s0 + $0x28] sm:$0xff]  ;;  %p2220_p4 = pnand %p2219_p3, %p2213_p0 }
  0x92   :  { %v664_v43 = vadd.f32 %v263_v1, %v247_v17  ;;  %v4801_v11 = vpack.c.bf16 %v3433_v8, %v3428_v36  ;;  %v4802_v31 = vpack.c.bf16 %v3661_v41, %v3656_v48  ;;  %v681_v50 = vadd.f32 %v680_v62, %v328_v25  ;;  %v3863_v36 = vld [vmem:[%s4658_s0 + $0x68] sm:$0xff] }
  0x93   :  { %2118 = vmatpush3.bf16.msra.mxu1 %v4800_v46  ;;  %v215_v3 = vunpack.c.l.bf16 %v3791_v14  ;;  %v311_v29 = vunpack.c.l.bf16 %v3804_v39  ;;  %v457_v12 = vadd.f32 %v456_v57, %v167_v59  ;;  %v4803_v8 = vpack.c.bf16 %v3702_v16, %v3697_v63  ;;  %v3872_v47 = vld [vmem:[%s4658_s0 + $0x1e8] sm:$0xff] }
  0x94   :  { %2120 = vmatprep.subr.bf16.mxu1 %v4801_v11  ;;  %2110 = vmatpush3.bf16.msra.mxu0 %v4802_v31  ;;  %v475_v48 = vadd.f32 %v474_v20, %v473_v60  ;;  %v327_v14 = vunpack.c.l.bf16 %v3809_v6  ;;  %v665_v41 = vadd.f32 %v664_v43, %v279_v9  ;;  %v2147_v7 = vpack.c.bf16 %v977_v33, %v976_v18  ;;  %v3884_v16 = vld [vmem:[%s4658_s0 + $0xa8] sm:$0xff]  ;;  %v3960_v11 = vld [vmem:[%s4659_s1 + $0x570] sm:$0xff]  ;;  %v3965_v31 = vld [vmem:[%s4659_s1 + $0x578] sm:$0xff] }
  0x95   :  { %2112 = vmatprep.subr.bf16.mxu0 %v4803_v8  ;;  %v683_v42 = vadd.f32 %v682_v40, %v681_v50  ;;  %v458_v44 = vadd.f32 %v457_v12, %v183_v55  ;;  %v461_v63 = vsel %vm356_vm0, %v231_v49, 0.0  ;;  %v669_v20 = vsel %vm356_vm0, %v343_v53, 0.0  ;;  %v3889_v6 = vld [vmem:[%s4658_s0 + $0xe8] sm:$0xff] }
  0x96   :  { %v4804_v35 = vpack.c.bf16 %v3455_v34, %v3450_v13  ;;  %v476_v40 = vrot.slane %v475_v48, 4  ;;  %v666_v54 = vadd.f32 %v665_v41, %v295_v22  ;;  %v3902_v24 = vld [vmem:[%s4658_s0 + $0x268] sm:$0xff]  ;;  %v138_v39 = vunpack.c.h.bf16 %v3858_v5 }
  0x97   :  { %v154_v45 = vunpack.c.h.bf16 %v3863_v36  ;;  %v4805_v13 = vpack.c.bf16 %v3492_v2, %v3487_v19  ;;  %v4806_v34 = vpack.c.bf16 %v3718_v15, %v3707_v51  ;;  %v684_v37 = vrot.slane %v683_v42, 4  ;;  %v3915_v52 = vld [vmem:[%s4658_s0 + $0x168] sm:$0xff] }
  0x98   :  { %2122 = vmatpush3.bf16.msra.mxu1 %v4804_v35  ;;  %v459_v25 = vadd.f32 %v458_v44, %v199_v0  ;;  %v250_v10 = vunpack.c.h.bf16 %v3872_v47  ;;  %v266_v32 = vunpack.c.h.bf16 %v3877_v61  ;;  %v477_v23 = vadd.f32 %v476_v40, %v475_v48  ;;  %v3922_v19 = vld [vmem:[%s4658_s0 + $0x2a8] sm:$0xff]  ;;  %v4811_v44 = vld [vmem:[#allocation16_spill] sm:$0xff] }
  0x99   :  { %2124 = vmatprep.subr.bf16.mxu1 %v4805_v13  ;;  %2114 = vmatpush3.bf16.msra.mxu0 %v4806_v34  ;;  %v667_v59 = vadd.f32 %v666_v54, %v311_v29  ;;  %v170_v2 = vunpack.c.h.bf16 %v3884_v16  ;;  %v186_v51 = vunpack.c.h.bf16 %v3889_v6  ;;  %v685_v15 = vadd.f32 %v684_v37, %v683_v42  ;;  %v3929_v1 = vld [vmem:[%s4658_s0 + $0x1a8] sm:$0x11]  ;;  %v4810_v42 = vld [vmem:[#allocation15_spill] sm:$0xff]  ;;  %v3991_v37 = vld [vmem:[%s4659_s1 + $0x780] sm:$0xff] }
  0x9a   :  { %2148 = vmatprep.subr.bf16.mxu0 %v2147_v7  ;;  %v460_v17 = vadd.f32 %v459_v25, %v215_v3  ;;  %v202_v27 = vunpack.c.h.bf16 %v3897_v26  ;;  %v282_v21 = vunpack.c.h.bf16 %v3902_v24  ;;  %v4807_v55 = vpack.c.bf16 %v3502_v38, %v3497_v58  ;;  %v3939_v49 = vld [vmem:[%s4658_s0 + $0x2e8] sm:$0xff] }
  0x9b   :  { %v478_v9 = vrot.slane %v477_v23, 2  ;;  %v668_v62 = vadd.f32 %v667_v59, %v327_v14  ;;  %v218_v53 = vunpack.c.h.bf16 %v3915_v52  ;;  %v495_v57 = vadd.f32 %v154_v45, %v138_v39  ;;  %v3948_v58 = vld [vmem:[%s4658_s0 + $0x368] sm:$0x11]  ;;  %v3979_v39 = vld [vmem:[%s4659_s1 + $0x600] sm:$0xff] }
  0x9c   :  { %2126 = vmatpush3.bf16.msra.mxu1 %v4807_v55  ;;  %v4808_v18 = vpack.c.bf16 %v3530_v30, %v3525_v56  ;;  %v686_v33 = vrot.slane %v685_v15, 2  ;;  %v462_v46 = vadd.f32 %v461_v63, %v460_v17  ;;  %v298_v38 = vunpack.c.h.bf16 %v3922_v19  ;;  %v3954_v43 = vld [vmem:[%s4658_s0 + $0x328] sm:$0xff] }
  0x9d   :  { %v703_v60 = vadd.f32 %v266_v32, %v250_v10  ;;  %v479_v0 = vadd.f32 %v478_v9, %v477_v23  ;;  %v670_v22 = vadd.f32 %v669_v20, %v668_v62  ;;  %v234_v56 = vunpack.c.h.bf16 %v3929_v1  ;;  %v3996_v25 = vld [vmem:[%s4659_s1 + $0x788] sm:$0xff] }
  0x9e   :  { %2128 = vmatprep.subr.bf16.mxu1 %v4808_v18  ;;  %v496_v30 = vadd.f32 %v495_v57, %v170_v2  ;;  %v687_v50 = vadd.f32 %v686_v33, %v685_v15  ;;  %v463_v3 = vrot.slane %v462_v46, 4  ;;  %v314_v29 = vunpack.c.h.bf16 %v3939_v49  ;;  %v4813_v2 = vld [vmem:[#allocation5_spill] sm:$0xff]  ;;  %v4817_v62 = vld [vmem:[#allocation22_spill] sm:$0xff] }
  0x9f   :  { %v704_v12 = vadd.f32 %v703_v60, %v282_v21  ;;  %v4809_v8 = vpack.c.bf16 %v3540_v28, %v3535_v4  ;;  %v480_v48 = vrot.slane %v479_v0, 1  ;;  %v671_v14 = vrot.slane %v670_v22, 4  ;;  %v3984_v4 = vld [vmem:[%s4659_s1 + $0x608] sm:$0xff] }
  0xa0   :  { %v346_v41 = vunpack.c.h.bf16 %v3948_v58  ;;  %v497_v7 = vadd.f32 %v496_v30, %v186_v51  ;;  %v4812_v63 = vpack.c.bf16 %v4810_v42, %v4811_v44  ;;  %v688_v20 = vrot.slane %v687_v50, 1  ;;  %v4814_v51 = vld [vmem:[#allocation6_spill] sm:$0xff]  ;;  %v4816_v9 = vld [vmem:[#allocation21_spill] sm:$0xff]  ;;  %v4822_v42 = vld [vmem:[#allocation23_spill] sm:$0xff] }
  0xa1   :  { %2130 = vmatpush3.bf16.msra.mxu1 %v4809_v8  ;;  %v464_v35 = vadd.f32 %v463_v3, %v462_v46  ;;  %v330_v40 = vunpack.c.h.bf16 %v3954_v43  ;;  %v705_v54 = vadd.f32 %v704_v12, %v298_v38  ;;  %v2145_v28 = vpack.c.bf16 %v3965_v31, %v3960_v11  ;;  %v4820_v12 = vld [vmem:[#allocation8_spill] sm:$0xff]  ;;  %v4193_v31 = vld [vmem:[%s4659_s1 + $0x648] sm:$0xff] }
  0xa2   :  { %2132 = vmatprep.subr.bf16.mxu1 %v4812_v63  ;;  %v481_v45 = vadd.f32 %v480_v48, %v479_v0  ;;  %v672_v13 = vadd.f32 %v671_v14, %v670_v22  ;;  %v498_v34 = vadd.f32 %v497_v7, %v202_v27  ;;  %v689_v10 = vadd.f32 %v688_v20, %v687_v50  ;;  %v978_v20 = vld [vmem:[%s4659_s1 + $0x690] sm:$0xff]  ;;  %v4188_v11 = vld [vmem:[%s4659_s1 + $0x640] sm:$0xff] }
  0xa3   :  { %v465_v32 = vrot.slane %v464_v35, 2  ;;  %v500_v23 = vsel %vm356_vm0, %v234_v56, 0.0  ;;  %v706_v59 = vadd.f32 %v705_v54, %v314_v29  ;;  %v4815_v15 = vpack.c.bf16 %v4813_v2, %v4814_v51  ;;  %v4819_v29 = vld [vmem:[#allocation7_spill] sm:$0xff] }
  0xa4   :  { %v673_v17 = vrot.slane %v672_v13, 2  ;;  %v499_v27 = vadd.f32 %v498_v34, %v218_v53  ;;  %v708_v21 = vsel %vm356_vm0, %v346_v41, 0.0  ;;  %v2149_v55 = vpack.c.bf16 %v3984_v4, %v3979_v39  ;;  %v4826_v34 = vld [vmem:[#allocation10_spill] sm:$0xff] }
  0xa5   :  { %2134 = vmatpush3.bf16.msra.mxu1 %v4815_v15  ;;  %v4818_v57 = vpack.c.bf16 %v4816_v9, %v4817_v62  ;;  %v1066_v18 = vsel %vm1056_vm1, %v689_v10, %v481_v45  ;;  %v466_v33 = vadd.f32 %v465_v32, %v464_v35  ;;  %v707_v46 = vadd.f32 %v706_v59, %v330_v40  ;;  %v4061_v51 = vld [vmem:[%s4659_s1 + $0x790] sm:$0xff]  ;;  %v4066_v15 = vld [vmem:[%s4659_s1 + $0x798] sm:$0xff]  ;;  %v4086_v9 = vld [vmem:[%s4659_s1 + $0x6a8] sm:$0xff] }
  0xa6   :  { %v2179_v38 = vpack.c.bf16 %v3996_v25, %v3991_v37  ;;  %1433 = vmatprep.mubr.f32.mxu0 %v1066_v18  ;;  %v674_v60 = vadd.f32 %v673_v17, %v672_v13  ;;  %v501_v0 = vadd.f32 %v500_v23, %v499_v27  ;;  %v137_v53 = vunpack.c.l.bf16 %v3858_v5  ;;  %v4823_v5 = vld [vmem:[#allocation24_spill] sm:$0xff]  ;;  %v4042_v13 = vld [vmem:[%s4659_s1 + $0x708] sm:$0xff]  ;;  %v4071_v17 = vld [vmem:[%s4659_s1 + $0x710] sm:$0xff] }
  0xa7   :  { %2136 = vmatprep.subr.bf16.mxu1 %v4818_v57  ;;  %v153_v22 = vunpack.c.l.bf16 %v3863_v36  ;;  %v467_v56 = vrot.slane %v466_v33, 1  ;;  %v709_v30 = vadd.f32 %v708_v21, %v707_v46  ;;  %v249_v50 = vunpack.c.l.bf16 %v3872_v47  ;;  %v4076_v27 = vld [vmem:[%s4659_s1 + $0x718] sm:$0xff]  ;;  %v4081_v21 = vld [vmem:[%s4659_s1 + $0x6a0] sm:$0xff]  ;;  %v4220_v25 = vld [vmem:[%s4659_s1 + $0x748] sm:$0xff] }
  0xa8   :  { %v265_v3 = vunpack.c.l.bf16 %v3877_v61  ;;  %v4821_v8 = vpack.c.bf16 %v4819_v29, %v4820_v12  ;;  %v675_v48 = vrot.slane %v674_v60, 1  ;;  %v502_v14 = vrot.slane %v501_v0, 4  ;;  %v4828_v62 = vld [vmem:[#allocation11_spill] sm:$0xff]  ;;  %v4829_v57 = vld [vmem:[#allocation12_spill] sm:$0xff]  ;;  %v4124_v12 = vld [vmem:[%s4659_s1 + $0x728] sm:$0xff]  ;;  %4834 = vst [vmem:[#allocation17_spill] sm:$0xff] %v4220_v25 }
  0xa9   :  { %v169_v41 = vunpack.c.l.bf16 %v3884_v16  ;;  %v185_v7 = vunpack.c.l.bf16 %v3889_v6  ;;  %v4824_v44 = vpack.c.bf16 %v4822_v42, %v4823_v5  ;;  %v468_v36 = vadd.f32 %v467_v56, %v466_v33  ;;  %v979_v16 = vld [vmem:[%s4659_s1 + $0x698] sm:$0xff]  ;;  %v4106_v56 = vld [vmem:[%s4659_s1 + $0x7a0] sm:$0xff]  ;;  %v4152_v5 = vld [vmem:[%s4659_s1 + $0x7b0] sm:$0xff] }
  0xaa   :  { %2138 = vmatpush3.bf16.msra.mxu1 %v4821_v8  ;;  %v710_v63 = vrot.slane %v709_v30, 4  ;;  %v201_v47 = vunpack.c.l.bf16 %v3897_v26  ;;  %v281_v61 = vunpack.c.l.bf16 %v3902_v24  ;;  %v676_v35 = vadd.f32 %v675_v48, %v674_v60  ;;  %v4037_v24 = vld [vmem:[%s4659_s1 + $0x700] sm:$0xff]  ;;  %v4147_v42 = vld [vmem:[%s4659_s1 + $0x638] sm:$0xff] }
  0xab   :  { %2140 = vmatprep.subr.bf16.mxu1 %v4824_v44  ;;  %v503_v6 = vadd.f32 %v502_v14, %v501_v0  ;;  %v233_v40 = vunpack.c.l.bf16 %v3929_v1  ;;  %v482_v54 = vadd.f32 %v153_v22, %v137_v53  ;;  %v297_v4 = vunpack.c.l.bf16 %v3922_v19  ;;  %v4047_v1 = vld [vmem:[%s4659_s1 + $0x610] sm:$0xff]  ;;  %v4052_v19 = vld [vmem:[%s4659_s1 + $0x618] sm:$0xff]  ;;  %v4096_v53 = vld [vmem:[%s4659_s1 + $0x620] sm:$0xff] }
  0xac   :  { %v711_v39 = vadd.f32 %v710_v63, %v709_v30  ;;  %v345_v26 = vunpack.c.l.bf16 %v3948_v58  ;;  %v690_v45 = vadd.f32 %v265_v3, %v249_v50  ;;  %v4825_v58 = vld [vmem:[#allocation9_spill] sm:$0xff]  ;;  %v1065_v32 = vsel %vm1056_vm1, %v676_v35, %v468_v36  ;;  %v4157_v44 = vld [vmem:[%s4659_s1 + $0x7b8] sm:$0xff]  ;;  %v4162_v36 = vld [vmem:[%s4659_s1 + $0x730] sm:$0xff] }
  0xad   :  { %v4827_v10 = vpack.c.bf16 %v4825_v58, %v4826_v34  ;;  %v504_v23 = vrot.slane %v503_v6, 2  ;;  %v483_v59 = vadd.f32 %v482_v54, %v169_v41  ;;  %v2151_v2 = vpack.c.bf16 %v979_v16, %v978_v20  ;;  %1434 = vmatmul.mubr.f32.vlgmr.msra.gmra.mrb[4].mxu0 %v1065_v32  ;;  %v4101_v22 = vld [vmem:[%s4659_s1 + $0x628] sm:$0xff]  ;;  %v4119_v29 = vld [vmem:[%s4659_s1 + $0x720] sm:$0xff]  ;;  %v4167_v63 = vld [vmem:[%s4659_s1 + $0x738] sm:$0xff] }
  0xae   :  { %v4830_v18 = vpack.c.bf16 %v4828_v62, %v4829_v57  ;;  %v712_v33 = vrot.slane %v711_v39, 2  ;;  %v217_v46 = vunpack.c.l.bf16 %v3915_v52  ;;  %v313_v60 = vunpack.c.l.bf16 %v3939_v49  ;;  %v4111_v52 = vld [vmem:[%s4659_s1 + $0x7a8] sm:$0xff]  ;;  %2150 = vmatpush3.bf16.msra.mxu0 %v2149_v55  ;;  %v4129_v55 = vld [vmem:[%s4659_s1 + $0x6b0] sm:$0xff]  ;;  %v4215_v37 = vld [vmem:[%s4659_s1 + $0x740] sm:$0xff] }
  0xaf   :  { %2142 = vmatpush3.bf16.msra.mxu1 %v4827_v10  ;;  %v691_v0 = vadd.f32 %v690_v45, %v281_v61  ;;  %v505_v49 = vadd.f32 %v504_v23, %v503_v6  ;;  %v329_v30 = vunpack.c.l.bf16 %v3954_v43  ;;  %v484_v50 = vadd.f32 %v483_v59, %v185_v7  ;;  %v4134_v43 = vld [vmem:[%s4659_s1 + $0x6b8] sm:$0xff]  ;;  %2152 = vmatprep.subr.bf16.mxu0 %v2151_v2  ;;  %v4142_v7 = vld [vmem:[%s4659_s1 + $0x630] sm:$0xff]  ;;  %v4178_v6 = vld [vmem:[%s4659_s1 + $0x6c0] sm:$0xff] }
  0xb0   :  { %2144 = vmatprep.subr.bf16.mxu1 %v4830_v18  ;;  %v2153_v3 = vpack.c.bf16 %v4052_v19, %v4047_v1  ;;  %v713_v8 = vadd.f32 %v712_v33, %v711_v39  ;;  %v487_v48 = vsel %vm356_vm0, %v233_v40, 0.0  ;;  %v2155_v41 = vpack.c.bf16 %v4086_v9, %v4081_v21  ;;  %v4183_v40 = vld [vmem:[%s4659_s1 + $0x6c8] sm:$0xff]  ;;  %4833 = vst [vmem:[#allocation18_spill] sm:$0xff] %v4215_v37  ;;  %v4230_v45 = vld [vmem:[%s4659_s1 + $0x6d8] sm:$0xff]  ;;  %v4239_v10 = vld [vmem:[%s4659_s1 + $0x650] sm:$0xff] }
  0xb1   :  { %v692_v14 = vadd.f32 %v691_v0, %v297_v4  ;;  %v506_v61 = vrot.slane %v505_v49, 1  ;;  %v485_v20 = vadd.f32 %v484_v50, %v201_v47  ;;  %v695_v16 = vsel %vm356_vm0, %v345_v26, 0.0  ;;  %v4205_v4 = vld [vmem:[%s4659_s1 + $0x7c0] sm:$0xff]  ;;  %v4210_v26 = vld [vmem:[%s4659_s1 + $0x7c8] sm:$0xff]  ;;  %v4244_v32 = vld [vmem:[%s4659_s1 + $0x658] sm:$0xff] }
  0xb2   :  { %4831 = vst [vmem:[#allocation14_spill] sm:$0xff] %v4205_v4  ;;  %4832 = vst [vmem:[#allocation13_spill] sm:$0xff] %v4210_v26  ;;  %2154 = vmatpush3.bf16.msra.mxu0 %v2153_v3  ;;  %v2157_v58 = vpack.c.bf16 %v4101_v22, %v4096_v53  ;;  %v4249_v23 = vld [vmem:[%s4659_s1 + $0x7d0] sm:$0xff]  ;;  %v4254_v59 = vld [vmem:[%s4659_s1 + $0x7d8] sm:$0xff]  ;;  %v2159_v18 = vpack.c.bf16 %v4134_v43, %v4129_v55  ;;  %v2161_v22 = vpack.c.bf16 %v4147_v42, %v4142_v7  ;;  %vm1658_vm2 = vcmask 254976  }
  0xb3   :  { %2146 = vmatpush3.bf16.msra.mxu1 %v2145_v28  ;;  %v714_v28 = vrot.slane %v713_v8, 1  ;;  %v693_v47 = vadd.f32 %v692_v14, %v313_v60  ;;  %v507_v1 = vadd.f32 %v506_v61, %v505_v49  ;;  %v486_v19 = vadd.f32 %v485_v20, %v217_v46  ;;  %4835 = vst [vmem:[#allocation20_spill] sm:$0xff] %v4249_v23  ;;  %v4259_v2 = vld [vmem:[%s4659_s1 + $0x750] sm:$0xff]  ;;  %v4264_v21 = vld [vmem:[%s4659_s1 + $0x758] sm:$0xff]  ;;  %v4273_v33 = vld [vmem:[%s4659_s1 + $0x6e0] sm:$0xff] }
  0xb4   :  { %2180 = vmatprep.subr.bf16.mxu1 %v2179_v38  ;;  %v4225_v38 = vld [vmem:[%s4659_s1 + $0x6d0] sm:$0xff]  ;;  %4836 = vst [vmem:[#allocation19_spill] sm:$0xff] %v4254_v59  ;;  %4837 = vst [vmem:[#allocation26_spill] sm:$0xff] %v4259_v2  ;;  %2156 = vmatprep.subr.bf16.mxu0 %v2155_v41  ;;  %v4278_v46 = vld [vmem:[%s4659_s1 + $0x6e8] sm:$0xff]  ;;  %v2165_v14 = vpack.c.bf16 %v4193_v31, %v4188_v11 }
  0xb5   :  { %4838 = vst [vmem:[#allocation25_spill] sm:$0xff] %v4264_v21  ;;  %v715_v9 = vadd.f32 %v714_v28, %v713_v8  ;;  %v694_v62 = vadd.f32 %v693_v47, %v329_v30  ;;  %v4283_v60 = vld [vmem:[%s4659_s1 + $0x660] sm:$0xff]  ;;  %v4288_v0 = vld [vmem:[%s4659_s1 + $0x668] sm:$0xff]  ;;  %v488_v53 = vadd.f32 %v487_v48, %v486_v19  ;;  %v2163_v48 = vpack.c.bf16 %v4183_v40, %v4178_v6  ;;  %v4324_v7 = vld [vmem:[%s4659_s1 + $0x6f0] sm:$0xff] }
  0xb6   :  { %v4299_v50 = vld [vmem:[%s4659_s1 + $0x7e0] sm:$0xff]  ;;  %v4304_v3 = vld [vmem:[%s4659_s1 + $0x7e8] sm:$0xff]  ;;  %v4329_v42 = vld [vmem:[%s4659_s1 + $0x6f8] sm:$0xff]  ;;  %2158 = vmatpush3.bf16.msra.mxu0 %v2157_v58  ;;  %v2167_v6 = vpack.c.bf16 %v4230_v45, %v4225_v38  ;;  %v2169_v47 = vpack.c.bf16 %v4244_v32, %v4239_v10  ;;  %v2171_v32 = vpack.c.bf16 %v4278_v46, %v4273_v33 }
  0xb7   :  { %4839 = vst [vmem:[#allocation15_spill] sm:$0xff] %v4299_v50  ;;  %4840 = vst [vmem:[#allocation16_spill] sm:$0xff] %v4304_v3  ;;  %v4309_v55 = vld [vmem:[%s4659_s1 + $0x760] sm:$0xff]  ;;  %v1068_v43 = vsel %vm1056_vm1, %v715_v9, %v507_v1  ;;  %v696_v8 = vadd.f32 %v695_v16, %v694_v62  ;;  %v4319_v41 = vld [vmem:[%s4659_s1 + $0x768] sm:$0xff]  ;;  %v489_v61 = vrot.slane %v488_v53, 4  ;;  %2160 = vmatprep.subr.bf16.mxu0 %v2159_v18 }
  0xb8   :  { %4841 = vst [vmem:[#allocation5_spill] sm:$0xff] %v4309_v55  ;;  %4842 = vst [vmem:[#allocation6_spill] sm:$0xff] %v4319_v41  ;;  %1503 = vmatprep.mubr.f32.mxu1 %v1068_v43  ;;  %v4340_v40 = vld [vmem:[%s4659_s1 + $0x670] sm:$0xff]  ;;  %v4361_v1 = vld [vmem:[%s4659_s1 + $0x678] sm:$0xff] }
  0xb9   :  { %v4345_v11 = vld [vmem:[%s4658_s0 + $0x30] sm:$0xff]  ;;  %v697_v28 = vrot.slane %v696_v8, 4  ;;  %v4371_v58 = vld [vmem:[%s4659_s1 + $0x7f8] sm:$0xff]  ;;  %v490_v10 = vadd.f32 %v489_v61, %v488_v53 }
  0xba   :  { %v4350_v31 = vld [vmem:[%s4658_s0 + $0x70] sm:$0xff]  ;;  %4844 = vst [vmem:[#allocation22_spill] sm:$0xff] %v4371_v58  ;;  %2162 = vmatpush3.bf16.msra.mxu0 %v2161_v22  ;;  %v139_v25 = vunpack.c.l.bf16 %v4345_v11 }
  0xbb   :  { %v4366_v19 = vld [vmem:[%s4659_s1 + $0x7f0] sm:$0xff]  ;;  %v698_v46 = vadd.f32 %v697_v28, %v696_v8  ;;  %v140_v8 = vunpack.c.h.bf16 %v4345_v11  ;;  %v156_v28 = vunpack.c.h.bf16 %v4350_v31  ;;  %v491_v53 = vrot.slane %v490_v10, 2  ;;  %2164 = vmatprep.subr.bf16.mxu0 %v2163_v48 }
  0xbc   :  { %4843 = vst [vmem:[#allocation21_spill] sm:$0xff] %v4366_v19  ;;  %v4382_v18 = vld [vmem:[%s4658_s0 + $0xb0] sm:$0xff] }
  0xbd   :  { %v4387_v43 = vld [vmem:[%s4658_s0 + $0x1f0] sm:$0xff]  ;;  %v699_v22 = vrot.slane %v698_v46, 2  ;;  %v172_v16 = vunpack.c.h.bf16 %v4382_v18  ;;  %v492_v38 = vadd.f32 %v491_v53, %v490_v10  ;;  %v521_v53 = vadd.f32 %v156_v28, %v140_v8 }
  0xbe   :  { %v4392_v33 = vld [vmem:[%s4658_s0 + $0x230] sm:$0xff]  ;;  %v252_v34 = vunpack.c.h.bf16 %v4387_v43  ;;  %2166 = vmatpush3.bf16.msra.mxu0 %v2165_v14  ;;  %v155_v8 = vunpack.c.l.bf16 %v4350_v31  ;;  %v4845_v31 = vpack.c.bf16 %v4042_v13, %v4037_v24 }
  0xbf   :  { %v4399_v61 = vld [vmem:[%s4658_s0 + $0xf0] sm:$0xff]  ;;  %v268_v39 = vunpack.c.h.bf16 %v4392_v33  ;;  %v700_v58 = vadd.f32 %v699_v22, %v698_v46  ;;  %v493_v41 = vrot.slane %v492_v38, 1  ;;  %2168 = vmatprep.subr.bf16.mxu0 %v2167_v6  ;;  %v522_v37 = vadd.f32 %v521_v53, %v172_v16 }
  0xc0   :  { %v4404_v62 = vld [vmem:[%s4658_s0 + $0x130] sm:$0xff]  ;;  %v188_v54 = vunpack.c.h.bf16 %v4399_v61  ;;  %v251_v6 = vunpack.c.l.bf16 %v4387_v43  ;;  %v267_v16 = vunpack.c.l.bf16 %v4392_v33  ;;  %v4534_v33 = vld [vmem:[%s4658_s0 + $0x178] sm:$0xff] }
  0xc1   :  { %v4409_v45 = vld [vmem:[%s4658_s0 + $0x270] sm:$0xff]  ;;  %v204_v35 = vunpack.c.h.bf16 %v4404_v62  ;;  %v729_v2 = vadd.f32 %v268_v39, %v252_v34  ;;  %v701_v21 = vrot.slane %v700_v58, 1  ;;  %v494_v46 = vadd.f32 %v493_v41, %v492_v38 }
  0xc2   :  { %v4422_v30 = vld [vmem:[%s4658_s0 + $0x1b0] sm:$0x11]  ;;  %v284_v19 = vunpack.c.h.bf16 %v4409_v45  ;;  %v523_v14 = vadd.f32 %v522_v37, %v188_v54  ;;  %2170 = vmatpush3.bf16.msra.mxu0 %v2169_v47  ;;  %v171_v34 = vunpack.c.l.bf16 %v4382_v18  ;;  %v283_v54 = vunpack.c.l.bf16 %v4409_v45  ;;  %v4509_v45 = vld [vmem:[%s4658_s0 + $0x1f8] sm:$0xff] }
  0xc3   :  { %v4427_v49 = vld [vmem:[%s4658_s0 + $0x370] sm:$0x11]  ;;  %v236_v55 = vunpack.c.h.bf16 %v4422_v30  ;;  %v702_v28 = vadd.f32 %v701_v21, %v700_v58  ;;  %2172 = vmatprep.subr.bf16.mxu0 %v2171_v32  ;;  %v235_v11 = vunpack.c.l.bf16 %v4422_v30  ;;  %v187_v21 = vunpack.c.l.bf16 %v4399_v61  ;;  %v4481_v30 = vld [vmem:[%s4658_s0 + $0x38] sm:$0xff] }
  0xc4   :  { %v4432_v57 = vld [vmem:[%s4658_s0 + $0x170] sm:$0xff]  ;;  %v348_v10 = vunpack.c.h.bf16 %v4427_v49  ;;  %v730_v22 = vadd.f32 %v729_v2, %v284_v19  ;;  %v524_v41 = vadd.f32 %v523_v14, %v204_v35  ;;  %v203_v38 = vunpack.c.l.bf16 %v4404_v62  ;;  %v4514_v58 = vld [vmem:[%s4658_s0 + $0x238] sm:$0xff] }
  0xc5   :  { %v4437_v20 = vld [vmem:[%s4658_s0 + $0x2b0] sm:$0xff]  ;;  %v220_v50 = vunpack.c.h.bf16 %v4432_v57  ;;  %v526_v4 = vsel %vm356_vm0, %v236_v55, 0.0  ;;  %v1067_v2 = vsel %vm1056_vm1, %v702_v28, %v494_v46  ;;  %v508_v55 = vadd.f32 %v155_v8, %v139_v25  ;;  %v4539_v61 = vld [vmem:[%s4658_s0 + $0x278] sm:$0xff] }
  0xc6   :  { %v4445_v48 = vld [vmem:[%s4658_s0 + $0x2f0] sm:$0xff]  ;;  %v300_v3 = vunpack.c.h.bf16 %v4437_v20  ;;  %v734_v26 = vsel %vm356_vm0, %v348_v10, 0.0  ;;  %1504 = vmatmul.mubr.f32.vlgmr.msra.gmra.mrb[4].mxu1 %v1067_v2  ;;  %v299_v35 = vunpack.c.l.bf16 %v4437_v20  ;;  %v716_v19 = vadd.f32 %v267_v16, %v251_v6  ;;  %v4494_v20 = vld [vmem:[%s4658_s0 + $0x78] sm:$0xff] }
  0xc7   :  { %v4450_v9 = vld [vmem:[%s4658_s0 + $0x330] sm:$0xff]  ;;  %v316_v23 = vunpack.c.h.bf16 %v4445_v48  ;;  %2182 = vmatpush3.bf16.msra.mxu1 %v4845_v31  ;;  %v525_v47 = vadd.f32 %v524_v41, %v220_v50  ;;  %v4847_v25 = vpack.c.bf16 %v4288_v0, %v4283_v60  ;;  %v219_v13 = vunpack.c.l.bf16 %v4432_v57  ;;  %v4566_v6 = vld [vmem:[%s4658_s0 + $0x378] sm:$0x11] }
  0xc8   :  { %v332_v59 = vunpack.c.h.bf16 %v4450_v9  ;;  %v731_v39 = vadd.f32 %v730_v22, %v300_v3  ;;  %v347_v3 = vunpack.c.l.bf16 %v4427_v49  ;;  %v315_v49 = vunpack.c.l.bf16 %v4445_v48  ;;  %v4552_v22 = vld [vmem:[%s4658_s0 + $0x1b8] sm:$0x11] }
  0xc9   :  { %2174 = vmatpush3.bf16.msra.mxu0 %v4847_v25  ;;  %v509_v50 = vadd.f32 %v508_v55, %v171_v34  ;;  %v331_v57 = vunpack.c.l.bf16 %v4450_v9  ;;  %v513_v60 = vsel %vm356_vm0, %v235_v11, 0.0  ;;  %v717_v0 = vadd.f32 %v716_v19, %v283_v54 }
  0xca   :  { %v732_v37 = vadd.f32 %v731_v39, %v316_v23  ;;  %v4846_v23 = vpack.c.bf16 %v4066_v15, %v4061_v51  ;;  %v4499_v51 = vld [vmem:[%s4658_s0 + $0xb8] sm:$0xff]  ;;  %v4848_v15 = vpack.c.bf16 %v4329_v42, %v4324_v7  ;;  %v721_v7 = vsel %vm356_vm0, %v347_v3, 0.0 }
  0xcb   :  { %v510_v62 = vadd.f32 %v509_v50, %v187_v21  ;;  %v4525_v42 = vld [vmem:[%s4658_s0 + $0x138] sm:$0xff]  ;;  %v142_v9 = vunpack.c.h.bf16 %v4481_v30  ;;  %v4849_v18 = vpack.c.bf16 %v4076_v27, %v4071_v17  ;;  %v718_v43 = vadd.f32 %v717_v0, %v299_v35  ;;  %v4856_v0 = vld [vmem:[#allocation14_spill] sm:$0xff] }
  0xcc   :  { %2184 = vmatprep.subr.bf16.mxu1 %v4846_v23  ;;  %v733_v24 = vadd.f32 %v732_v37, %v332_v59  ;;  %2176 = vmatprep.subr.bf16.mxu0 %v4848_v15  ;;  %v527_v59 = vadd.f32 %v526_v4, %v525_v47  ;;  %v4520_v4 = vld [vmem:[%s4658_s0 + $0xf8] sm:$0xff]  ;;  %v158_v48 = vunpack.c.h.bf16 %v4494_v20  ;;  %v174_v10 = vunpack.c.h.bf16 %v4499_v51 }
  0xcd   :  { %2186 = vmatpush3.bf16.msra.mxu1 %v4849_v18  ;;  %v4850_v17 = vpack.c.bf16 %v4111_v52, %v4106_v56  ;;  %v4851_v27 = vpack.c.bf16 %v4361_v1, %v4340_v40  ;;  %v511_v46 = vadd.f32 %v510_v62, %v203_v38  ;;  %v254_v8 = vunpack.c.h.bf16 %v4509_v45  ;;  %v4559_v56 = vld [vmem:[%s4658_s0 + $0x2b8] sm:$0xff] }
  0xce   :  { %v735_v32 = vadd.f32 %v734_v26, %v733_v24  ;;  %v528_v26 = vrot.slane %v527_v59, 4  ;;  %v270_v28 = vunpack.c.h.bf16 %v4514_v58  ;;  %v719_v39 = vadd.f32 %v718_v43, %v315_v49  ;;  %v4576_v37 = vld [vmem:[%s4658_s0 + $0x2f8] sm:$0xff] }
  0xcf   :  { %2188 = vmatprep.subr.bf16.mxu1 %v4850_v17  ;;  %2178 = vmatpush3.bf16.msra.mxu0 %v4851_v27  ;;  %v190_v52 = vunpack.c.h.bf16 %v4520_v4  ;;  %v206_v40 = vunpack.c.h.bf16 %v4525_v42  ;;  %v512_v34 = vadd.f32 %v511_v46, %v219_v13  ;;  %v222_v16 = vunpack.c.h.bf16 %v4534_v33 }
  0xd0   :  { %v736_v53 = vrot.slane %v735_v32, 4  ;;  %v529_v14 = vadd.f32 %v528_v26, %v527_v59  ;;  %v286_v2 = vunpack.c.h.bf16 %v4539_v61  ;;  %v4852_v41 = vpack.c.bf16 %v4124_v12, %v4119_v29  ;;  %v4585_v29 = vld [vmem:[%s4658_s0 + $0x338] sm:$0xff] }
  0xd1   :  { %v720_v54 = vadd.f32 %v719_v39, %v331_v57  ;;  %v238_v21 = vunpack.c.h.bf16 %v4552_v22  ;;  %v547_v3 = vadd.f32 %v158_v48, %v142_v9  ;;  %v4853_v55 = vpack.c.bf16 %v4157_v44, %v4152_v5 }
  0xd2   :  { %v737_v1 = vadd.f32 %v736_v53, %v735_v32  ;;  %2190 = vmatpush3.bf16.msra.mxu1 %v4852_v41  ;;  %v530_v11 = vrot.slane %v529_v14, 2  ;;  %v514_v47 = vadd.f32 %v513_v60, %v512_v34  ;;  %v302_v12 = vunpack.c.h.bf16 %v4559_v56  ;;  %v4855_v60 = vld [vmem:[#allocation13_spill] sm:$0xff]  ;;  %v4861_v34 = vld [vmem:[#allocation19_spill] sm:$0xff] }
  0xd3   :  { %2192 = vmatprep.subr.bf16.mxu1 %v4853_v55  ;;  %v755_v38 = vadd.f32 %v270_v28, %v254_v8  ;;  %v722_v19 = vadd.f32 %v721_v7, %v720_v54  ;;  %v350_v23 = vunpack.c.h.bf16 %v4566_v6  ;;  %v548_v25 = vadd.f32 %v547_v3, %v174_v10  ;;  %v1007_v10 = vld [vmem:[%s4659_s1 + $0x778] sm:$0xff]  ;;  %v4858_v8 = vld [vmem:[#allocation17_spill] sm:$0xff]  ;;  %v4859_v28 = vld [vmem:[#allocation18_spill] sm:$0xff] }
  0xd4   :  { %v738_v31 = vrot.slane %v737_v1, 2  ;;  %v531_v35 = vadd.f32 %v530_v11, %v529_v14  ;;  %v515_v13 = vrot.slane %v514_v47, 4  ;;  %v318_v5 = vunpack.c.h.bf16 %v4576_v37 }
  0xd5   :  { %v756_v44 = vadd.f32 %v755_v38, %v286_v2  ;;  %v4854_v49 = vpack.c.bf16 %v4167_v63, %v4162_v36  ;;  %v723_v15 = vrot.slane %v722_v19, 4  ;;  %v334_v59 = vunpack.c.h.bf16 %v4585_v29  ;;  %v1006_v63 = vld [vmem:[%s4659_s1 + $0x770] sm:$0xff]  ;;  %v4862_v2 = vld [vmem:[#allocation20_spill] sm:$0xff]  ;;  %v4864_v38 = vld [vmem:[#allocation25_spill] sm:$0xff] }
  0xd6   :  { %v739_v24 = vadd.f32 %v738_v31, %v737_v1  ;;  %v532_v50 = vrot.slane %v531_v35, 1  ;;  %v549_v57 = vadd.f32 %v548_v25, %v190_v52  ;;  %v4857_v32 = vpack.c.bf16 %v4855_v60, %v4856_v0 }
  0xd7   :  { %2194 = vmatpush3.bf16.msra.mxu1 %v4854_v49  ;;  %v516_v7 = vadd.f32 %v515_v13, %v514_v47  ;;  %v552_v9 = vsel %vm356_vm0, %v238_v21, 0.0  ;;  %v757_v18 = vadd.f32 %v756_v44, %v302_v12  ;;  %v724_v43 = vadd.f32 %v723_v15, %v722_v19  ;;  %v4867_v13 = vld [vmem:[#allocation16_spill] sm:$0xff] }
  0xd8   :  { %2196 = vmatprep.subr.bf16.mxu1 %v4857_v32  ;;  %v740_v62 = vrot.slane %v739_v24, 1  ;;  %v533_v26 = vadd.f32 %v532_v50, %v531_v35  ;;  %v550_v48 = vadd.f32 %v549_v57, %v206_v40  ;;  %v760_v36 = vsel %vm356_vm0, %v350_v23, 0.0  ;;  %v4865_v35 = vld [vmem:[#allocation26_spill] sm:$0xff] }
  0xd9   :  { %v517_v27 = vrot.slane %v516_v7, 2  ;;  %v758_v53 = vadd.f32 %v757_v18, %v318_v5  ;;  %v141_v46 = vunpack.c.l.bf16 %v4481_v30  ;;  %v4860_v14 = vpack.c.bf16 %v4858_v8, %v4859_v28  ;;  %v4868_v5 = vld [vmem:[#allocation15_spill] sm:$0xff] }
  0xda   :  { %v741_v17 = vadd.f32 %v740_v62, %v739_v24  ;;  %v725_v39 = vrot.slane %v724_v43, 2  ;;  %v551_v52 = vadd.f32 %v550_v48, %v222_v16  ;;  %v157_v40 = vunpack.c.l.bf16 %v4494_v20  ;;  %v4870_v62 = vld [vmem:[#allocation6_spill] sm:$0xff] }
  0xdb   :  { %2198 = vmatpush3.bf16.msra.mxu1 %v4860_v14  ;;  %v253_v1 = vunpack.c.l.bf16 %v4509_v45  ;;  %v4863_v41 = vpack.c.bf16 %v4861_v34, %v4862_v2  ;;  %v518_v54 = vadd.f32 %v517_v27, %v516_v7  ;;  %v759_v21 = vadd.f32 %v758_v53, %v334_v59  ;;  %v4871_v7 = vld [vmem:[#allocation5_spill] sm:$0xff]  ;;  %v4873_v48 = vld [vmem:[#allocation22_spill] sm:$0xff] }
  0xdc   :  { %v1070_v11 = vsel %vm1056_vm1, %v741_v17, %v533_v26  ;;  %v269_v30 = vunpack.c.l.bf16 %v4514_v58  ;;  %v2209_v3 = vpack.c.bf16 %v1007_v10, %v1006_v63  ;;  %v726_v55 = vadd.f32 %v725_v39, %v724_v43 }
  0xdd   :  { %2200 = vmatprep.subr.bf16.mxu1 %v4863_v41  ;;  %1573 = vmatprep.mubr.f32.mxu0 %v1070_v11  ;;  %v553_v31 = vadd.f32 %v552_v9, %v551_v52  ;;  %v173_v16 = vunpack.c.l.bf16 %v4499_v51  ;;  %v519_v47 = vrot.slane %v518_v54, 1  ;;  %v761_v20 = vadd.f32 %v760_v36, %v759_v21  ;;  %v4874_v36 = vld [vmem:[#allocation21_spill] sm:$0xff] }
  0xde   :  { %v189_v45 = vunpack.c.l.bf16 %v4520_v4  ;;  %v285_v12 = vunpack.c.l.bf16 %v4539_v61  ;;  %v4866_v19 = vpack.c.bf16 %v4864_v38, %v4865_v35  ;;  %v727_v23 = vrot.slane %v726_v55, 1 }
  0xdf   :  { %v554_v25 = vrot.slane %v553_v31, 4  ;;  %v205_v58 = vunpack.c.l.bf16 %v4525_v42  ;;  %v534_v24 = vadd.f32 %v157_v40, %v141_v46  ;;  %v4869_v44 = vpack.c.bf16 %v4867_v13, %v4868_v5 }
  0xe0   :  { %2202 = vmatpush3.bf16.msra.mxu1 %v4866_v19  ;;  %v520_v51 = vadd.f32 %v519_v47, %v518_v54  ;;  %v762_v49 = vrot.slane %v761_v20, 4  ;;  %v301_v50 = vunpack.c.l.bf16 %v4559_v56  ;;  %v742_v4 = vadd.f32 %v269_v30, %v253_v1 }
  0xe1   :  { %2204 = vmatprep.subr.bf16.mxu1 %v4869_v44  ;;  %v728_v15 = vadd.f32 %v727_v23, %v726_v55  ;;  %v555_v61 = vadd.f32 %v554_v25, %v553_v31  ;;  %v221_v59 = vunpack.c.l.bf16 %v4534_v33  ;;  %v535_v57 = vadd.f32 %v534_v24, %v173_v16 }
  0xe2   :  { %v763_v60 = vadd.f32 %v762_v49, %v761_v20  ;;  %v237_v0 = vunpack.c.l.bf16 %v4552_v22  ;;  %v317_v42 = vunpack.c.l.bf16 %v4576_v37  ;;  %v743_v32 = vadd.f32 %v742_v4, %v285_v12 }
  0xe3   :  { %v4872_v9 = vpack.c.bf16 %v4870_v62, %v4871_v7  ;;  %v1069_v18 = vsel %vm1056_vm1, %v728_v15, %v520_v51  ;;  %v556_v26 = vrot.slane %v555_v61, 2  ;;  %v349_v56 = vunpack.c.l.bf16 %v4566_v6 }
  0xe4   :  { %v536_v43 = vadd.f32 %v535_v57, %v189_v45  ;;  %v4875_v33 = vpack.c.bf16 %v4873_v48, %v4874_v36  ;;  %1574 = vmatmul.mubr.f32.vlgmr.msra.gmra.mrb[6].mxu0 %v1069_v18  ;;  %v764_v63 = vrot.slane %v763_v60, 2  ;;  %v333_v22 = vunpack.c.l.bf16 %v4585_v29  ;;  %v1674_v36 = vld [vmem:[%s4660_s2] ss:$0 sm:$0xff] }
  0xe5   :  { %2206 = vmatpush3.bf16.msra.mxu1 %v4872_v9  ;;  %v744_v37 = vadd.f32 %v743_v32, %v301_v50  ;;  %v557_v10 = vadd.f32 %v556_v26, %v555_v61  ;;  %v539_v53 = vsel %vm356_vm0, %v237_v0, 0.0  ;;  %v747_v6 = vsel %vm356_vm0, %v349_v56, 0.0 }
  0xe6   :  { %2208 = vmatprep.subr.bf16.mxu1 %v4875_v33  ;;  %v537_v17 = vadd.f32 %v536_v43, %v205_v58  ;;  %v765_v27 = vadd.f32 %v764_v63, %v763_v60 }
  0xe7   :  { %v745_v46 = vadd.f32 %v744_v37, %v317_v42  ;;  %v558_v8 = vrot.slane %v557_v10, 1 }
  0xe8   :  { %v538_v28 = vadd.f32 %v537_v17, %v221_v59  ;;  %v766_v14 = vrot.slane %v765_v27, 1 }
  0xe9   :  { %2210 = vmatpush3.bf16.msra.mxu1 %v2209_v3  ;;  %v746_v39 = vadd.f32 %v745_v46, %v333_v22  ;;  %v559_v52 = vadd.f32 %v558_v8, %v557_v10 }
  0xea   :  { %v540_v40 = vadd.f32 %v539_v53, %v538_v28  ;;  %v767_v1 = vadd.f32 %v766_v14, %v765_v27 }
  0xeb   :  { %v748_v34 = vadd.f32 %v747_v6, %v746_v39 }
  0xec   :  { %v541_v2 = vrot.slane %v540_v40, 4  ;;  %v1072_v29 = vsel %vm1056_vm1, %v767_v1, %v559_v52 }
  0xed   :  { %v749_v41 = vrot.slane %v748_v34, 4  ;;  %1643 = vmatprep.mubr.f32.mxu1 %v1072_v29 }
  0xee   :  { %v542_v11 = vadd.f32 %v541_v2, %v540_v40 }
  0xef   :  { %v750_v54 = vadd.f32 %v749_v41, %v748_v34 }
  0xf0   :  { %v543_v21 = vrot.slane %v542_v11, 2 }
  0xf1   :  { %v751_v30 = vrot.slane %v750_v54, 2 }
  0xf2   :  { %v544_v3 = vadd.f32 %v543_v21, %v542_v11 }
  0xf3   :  { %v752_v55 = vadd.f32 %v751_v30, %v750_v54 }
  0xf4   :  { %v545_v31 = vrot.slane %v544_v3, 1 }
  0xf5   :  { %v753_v16 = vrot.slane %v752_v55, 1 }
  0xf6   :  { %v546_v47 = vadd.f32 %v545_v31, %v544_v3 }
  0xf7   :  { %v754_v20 = vadd.f32 %v753_v16, %v752_v55 }
  0xf9   :  { %v1071_v45 = vsel %vm1056_vm1, %v754_v20, %v546_v47 }
  0xfa   :  { %1644 = vmatmul.mubr.f32.vlgmr.msra.gmra.mrb[6].mxu1 %v1071_v45 }
 0x117   :  { %v1707_v12 = vpop.f32.mrb[0].mxu0 }
 0x118   :  { %v1708_v38 = vpop.f32.mrb[1].mxu0 }
 0x119   :  { %v1709_v35 = vadd.f32 %v1708_v38, %v1707_v12 }
 0x123   :  { %v1742_v19 = vpop.f32.mrb[0].mxu1 }
 0x124   :  { %v1743_v23 = vpop.f32.mrb[1].mxu1 }
 0x125   :  { %v1744_v25 = vadd.f32 %v1743_v23, %v1742_v19 }
 0x127   :  { %v1226_v58 = vadd.f32 %v1744_v25, %v1709_v35 }
 0x146   :  { %v1777_v24 = vpop.f32.mrb[2].mxu0 }
 0x147   :  { %v1778_v13 = vpop.f32.mrb[3].mxu0 }
 0x148   :  { %v1779_v5 = vadd.f32 %v1778_v13, %v1777_v24 }
 0x14a   :  { %v1296_v44 = vadd.f32 %v1779_v5, %v1226_v58 }
 0x163   :  { %v1812_v51 = vpop.f32.mrb[2].mxu1 }
 0x164   :  { %v1813_v49 = vpop.f32.mrb[3].mxu1 }
 0x165   :  { %v1814_v50 = vadd.f32 %v1813_v49, %v1812_v51 }
 0x167   :  { %v1366_v4 = vadd.f32 %v1814_v50, %v1296_v44 }
 0x180   :  { %v1847_v15 = vpop.f32.mrb[4].mxu0 }
 0x181   :  { %v1848_v61 = vpop.f32.mrb[5].mxu0 }
 0x182   :  { %v1849_v59 = vadd.f32 %v1848_v61, %v1847_v15 }
 0x184   :  { %v1436_v57 = vadd.f32 %v1849_v59, %v1366_v4 }
 0x199   :  { %v1882_v60 = vpop.f32.mrb[4].mxu1 }
 0x19a   :  { %v1883_v0 = vpop.f32.mrb[5].mxu1 }
 0x19b   :  { %v1884_v42 = vadd.f32 %v1883_v0, %v1882_v60 }
 0x19d   :  { %v1506_v32 = vadd.f32 %v1884_v42, %v1436_v57 }
 0x1b7   :  { %v1917_v62 = vpop.f32.mrb[6].mxu0 }
 0x1b8   :  { %v1918_v7 = vpop.f32.mrb[7].mxu0 }
 0x1b9   :  { %v1919_v9 = vadd.f32 %v1918_v7, %v1917_v62 }
 0x1bb   :  { %v1576_v18 = vadd.f32 %v1919_v9, %v1506_v32 }
 0x1cd   :  { %v1952_v26 = vpop.f32.mrb[6].mxu1 }
 0x1ce   :  { %v1953_v56 = vpop.f32.mrb[7].mxu1 }
 0x1cf   :  { %v1954_v43 = vadd.f32 %v1953_v56, %v1952_v26 }
 0x1d1   :  { %v1646_v48 = vadd.f32 %v1954_v43, %v1576_v18 }
 0x1d3   :  { %v1649_v33 = vmul.f32 0.020408163, %v1646_v48 }
 0x1d5   :  { %v1657_v63 = vadd.f32 %v1674_v36, %v1649_v33 }
 0x1d7   :  { %1659 = vst.msk [vmem:[#allocation2] sm:$0x3] %vm1658_vm2, %v1657_v63 }
 0x1d8   :  { %2223 = shalt.err (!%p2220_p4)
}
 0x1d9   :  { %s2224_s24 = scalar_lea.hbm %s4661_s3, 32 }
 0x1da   :  { %p2225_p5 = scmp.ne.s32.totalorder %s4661_s3, %s2224_s24  ;;  %p2228_p6 = scmp.lt.u32.totalorder %s2224_s24, %s4661_s3 }
 0x1dc   :  { %p2230_p7 = pnand %p2228_p6, %p2225_p5 }
 0x1de   :  { %2233 = shalt.err (!%p2230_p7)
}
 0x1df   :  { %1669 = dma.vmem_to_hbm [thread:$0]  %s1667_s20, 32, %s4661_s3, [#allocation3]  }
 0x1e0   :  { %2234 = dma.done.wait [#allocation3], 32  }
 0x1e1   :  { %2235 = vsyncadd [#allocation3], 4294967264 }
 0x1e2   :  { %1673 = vsyncpa [#allocation3], 1 }

</bundles_post_ra>
